<compile_context>
chip_gen: v6e
topology: v6e:2x2x1
jax: 0.10.0
libtpu: 0.0.40
codegen_flags: <defaults>
</compile_context>

<pallas_src>
import functools

import jax
import jax.numpy as jnp
from jax import lax
from jax.experimental import pallas as pl
from jax.experimental.pallas import tpu as pltpu


def _mlp_kernel(x_ref, w0_ref, b0_ref, wh_ref, bh_ref, o_ref,
                *, num_hidden_layers):
    """Whole MLP for one batch tile; activations are (H, tile_b) in VMEM."""
    w_dtype = w0_ref.dtype
    x = x_ref[...].astype(w_dtype)                      # (tile_b, n_input)

    # Input layer: h[f, b] = sum_k w0[f, k] * x[b, k]   -> (H, tile_b)
    h = lax.dot_general(
        w0_ref[...], x,
        dimension_numbers=(((1,), (1,)), ((), ())),
        preferred_element_type=jnp.float32)
    h = jnp.maximum(h + b0_ref[...], 0.0)

    def layer(l, h):
        # Linear + ReLU; Dropout(p=0.5) is identity at inference.
        s = jnp.dot(wh_ref[l], h.astype(w_dtype),
                    preferred_element_type=jnp.float32)  # (H, tile_b)
        return jnp.maximum(s + bh_ref[l], 0.0)

    if num_hidden_layers <= 4:
        for l in range(num_hidden_layers):               # small L: static unroll
            h = layer(l, h)
    else:
        # Deep stacks: bound vreg live ranges (avoids spill blowup, esp. v5e).
        h = lax.fori_loop(0, num_hidden_layers, layer, h, unroll=2)

    # Fixed output layer Linear(H, 1) with weight 0.5 / bias 0.5, then Sigmoid,
    # as a sublane (XLU) reduction -> lane-dense (1, tile_b) store.
    z = 0.5 * jnp.sum(h, axis=0, keepdims=True) + 0.5
    o_ref[...] = jax.nn.sigmoid(z).astype(o_ref.dtype)


def surrogate_network_fixed_output(x, params, *, tile_b=None):
    """x: (B, n_input). params: dict from init_params (+ pad_params). -> (B, 1) f32."""
    w0, b0, wh, bh = params["w0"], params["b0"], params["wh"], params["bh"]
    B, n_input = x.shape
    hidden = w0.shape[0]
    L = wh.shape[0]
    assert w0.shape == (hidden, n_input), w0.shape
    assert b0.shape == (hidden, 1), b0.shape
    assert wh.shape == (L, hidden, hidden), wh.shape
    assert bh.shape == (L, hidden, 1), bh.shape

    # Batch tile: a single grid step for small batches (per-step pipeline
    # overhead dominates there); otherwise large lane-aligned tiles so the MXU
    # N dim is full and >= 2 parallel steps remain for the two v7x TensorCores.
    if tile_b is None:
        if B <= 1024:
            tile_b = B
        else:
            tile_b = next((c for c in (1024, 512, 256, 128) if B % c == 0), None)
            if tile_b is None:
                raise ValueError("for B > 1024, B must be a multiple of 128")
    if B % tile_b != 0:
        raise ValueError("batch must be a multiple of tile_b")
    num_tiles = B // tile_b
    if num_tiles > 1 and tile_b % 128 != 0:
        raise ValueError("tile_b must be a multiple of 128 when the batch is tiled")

    # Cast input to the weight dtype (no-op for f32; enables bf16 weights on
    # v6e/v7x while the MXU still accumulates in f32).
    x = x.astype(w0.dtype)

    kernel = functools.partial(_mlp_kernel, num_hidden_layers=L)

    # Explicit VMEM budget: resident weights (x2 in case single-buffering is
    # unavailable) + pipelined x/out tiles + f32 activations + headroom.
    w_item = jnp.dtype(w0.dtype).itemsize
    weight_bytes = (w0.size + b0.size + wh.size + bh.size) * w_item
    act_bytes = (2 * tile_b * n_input + 2 * tile_b) * x.dtype.itemsize \
                + 3 * hidden * tile_b * 4
    vmem_limit = int(min(max(2 * weight_bytes + act_bytes + (4 << 20), 32 << 20),
                         48 << 20))

    def call(weight_spec_kwargs):
        grid_spec = pltpu.PrefetchScalarGridSpec(
            num_scalar_prefetch=0,
            grid=(num_tiles,),
            in_specs=[
                pl.BlockSpec((tile_b, n_input), lambda i: (i, 0)),       # x tile
                pl.BlockSpec((hidden, n_input), lambda i: (0, 0),
                             **weight_spec_kwargs),                      # w0
                pl.BlockSpec((hidden, 1), lambda i: (0, 0),
                             **weight_spec_kwargs),                      # b0
                pl.BlockSpec((L, hidden, hidden), lambda i: (0, 0, 0),
                             **weight_spec_kwargs),                      # wh
                pl.BlockSpec((L, hidden, 1), lambda i: (0, 0, 0),
                             **weight_spec_kwargs),                      # bh
            ],
            out_specs=pl.BlockSpec((1, tile_b), lambda i: (0, i)),       # lane-dense out
        )
        return pl.pallas_call(
            kernel,
            out_shape=jax.ShapeDtypeStruct((1, B), jnp.float32),
            grid_spec=grid_spec,
            compiler_params=pltpu.CompilerParams(
                dimension_semantics=("parallel",),
                vmem_limit_bytes=vmem_limit),
        )(x, w0, b0, wh, bh)

    try:
        # Grid-invariant weights: request single buffering (halves resident
        # weight VMEM — matters on v7x where VMEM is 64 MiB).
        out = call({"pipeline_mode": pl.Buffered(1)})
    except Exception:
        # TODO(synk): this Pallas build rejects pipeline_mode on TPU BlockSpecs;
        # fall back to default (double-buffered) weight blocks.
        out = call({})

    return out.reshape(B, 1)


def _round_up(v, m):
    return (v + m - 1) // m * m


def init_params(key, n_input, hidden, num_hidden_layers, dtype=jnp.float32):
    """Synthetic parameters in torch layout: weights (out, in), biases (out, 1).

    The fixed output layer (weight 0.5, bias 0.5) is baked into the kernel and
    has no parameters here.
    """
    k0, k1, k2, k3 = jax.random.split(key, 4)
    w0 = (0.1 * jax.random.normal(k0, (hidden, n_input))).astype(dtype)
    b0 = (0.1 * jax.random.normal(k1, (hidden, 1))).astype(dtype)
    wh = (0.1 * jax.random.normal(k2, (num_hidden_layers, hidden, hidden))).astype(dtype)
    bh = (0.1 * jax.random.normal(k3, (num_hidden_layers, hidden, 1))).astype(dtype)
    return {"w0": w0, "b0": b0, "wh": wh, "bh": bh}


def pad_params(params, lane=128):
    """Zero-pad the hidden dim to a multiple of 128, once, at init time.

    Exact: padded units have zero weights/bias, stay 0 through every ReLU, and
    contribute 0 to the fixed 0.5*sum output layer.
    """
    w0, b0, wh, bh = params["w0"], params["b0"], params["wh"], params["bh"]
    hidden = w0.shape[0]
    hidden_p = _round_up(hidden, lane)
    if hidden_p == hidden:
        return dict(params)
    p = hidden_p - hidden
    return {
        "w0": jnp.pad(w0, ((0, p), (0, 0))),
        "b0": jnp.pad(b0, ((0, p), (0, 0))),
        "wh": jnp.pad(wh, ((0, 0), (0, p), (0, p))),
        "bh": jnp.pad(bh, ((0, 0), (0, p), (0, 0))),
    }


def reference_forward(x, params):
    """Pure-JAX reference (same broadcast-0.5 output-layer semantics)."""
    w0, b0, wh, bh = params["w0"], params["b0"], params["wh"], params["bh"]
    h = jnp.maximum(x @ w0.T + b0[:, 0], 0.0)
    for l in range(wh.shape[0]):
        h = jnp.maximum(h @ wh[l].T + bh[l, :, 0], 0.0)
    return jax.nn.sigmoid(0.5 * jnp.sum(h, axis=-1, keepdims=True) + 0.5)


if __name__ == "__main__":
    B, N_INPUT, HIDDEN, N_LAYERS = 16, 16, 32, 2

    key = jax.random.PRNGKey(0)
    kx, kp = jax.random.split(key)
    x = jax.random.normal(kx, (B, N_INPUT), jnp.float32)

    params = init_params(kp, N_INPUT, HIDDEN, N_LAYERS)          # logical sizes
    padded = pad_params(params)                                  # hidden -> 128

    out = surrogate_network_fixed_output(x, padded)
    out = jax.block_until_ready(out)

    ref = reference_forward(x, params)                           # unpadded reference
    assert out.shape == (B, 1)
    assert jnp.allclose(out, ref, atol=2e-5, rtol=2e-5), "mismatch vs reference"
    print("KERNEL_OK")
</pallas_src>

<mosaic_0001>
module attributes {stable_mosaic.version = 11 : i64} {
  func.func @_mlp_kernel(%arg0: i32, %arg1: memref<16x16xf32, #tpu.memory_space<vmem>>, %arg2: memref<128x16xf32, #tpu.memory_space<vmem>>, %arg3: memref<128x1xf32, #tpu.memory_space<vmem>>, %arg4: memref<2x128x128xf32, #tpu.memory_space<vmem>>, %arg5: memref<2x128x1xf32, #tpu.memory_space<vmem>>, %arg6: memref<1x16xf32, #tpu.memory_space<vmem>>) attributes {dimension_semantics = [#tpu.dimension_semantics<parallel>], iteration_bounds = array<i64: 1>, scalar_prefetch = 0 : i64, scratch_operands = 0 : i64, tpu.core_type = #tpu.core_type<tc>, window_params = [{transform_indices = @transform_0, window_bounds = array<i64: 16, 16>}, {pipeline_mode = #tpu.pipeline_mode<synchronous>, transform_indices = @transform_1, window_bounds = array<i64: 128, 16>}, {pipeline_mode = #tpu.pipeline_mode<synchronous>, transform_indices = @transform_2, window_bounds = array<i64: 128, 1>}, {pipeline_mode = #tpu.pipeline_mode<synchronous>, transform_indices = @transform_3, window_bounds = array<i64: 2, 128, 128>}, {pipeline_mode = #tpu.pipeline_mode<synchronous>, transform_indices = @transform_4, window_bounds = array<i64: 2, 128, 1>}, {transform_indices = @transform_5, window_bounds = array<i64: 1, 16>}]} {
    %c0 = arith.constant 0 : index
    %c0_0 = arith.constant 0 : index
    %0 = vector.load %arg1[%c0, %c0_0] : memref<16x16xf32, #tpu.memory_space<vmem>>, vector<16x16xf32>
    %c0_1 = arith.constant 0 : index
    %c0_2 = arith.constant 0 : index
    %1 = vector.load %arg2[%c0_1, %c0_2] : memref<128x16xf32, #tpu.memory_space<vmem>>, vector<128x16xf32>
    %cst = arith.constant dense<0.000000e+00> : vector<128x16xf32>
    %2 = tpu.matmul %1, %0, %cst {dimension_numbers = #tpu.dot_dimension_numbers<[1], [1], [0], [0], [0, 0, 1, 0], [], []>} : vector<128x16xf32>, vector<16x16xf32>, vector<128x16xf32> -> vector<128x16xf32>
    %c0_3 = arith.constant 0 : index
    %c0_4 = arith.constant 0 : index
    %3 = vector.load %arg3[%c0_3, %c0_4] : memref<128x1xf32, #tpu.memory_space<vmem>>, vector<128x1xf32>
    %4 = vector.broadcast %3 : vector<128x1xf32> to vector<128x16xf32>
    %5 = arith.addf %2, %4 : vector<128x16xf32>
    %cst_5 = arith.constant 0.000000e+00 : f32
    %6 = vector.broadcast %cst_5 : f32 to vector<128x16xf32>
    %7 = arith.maximumf %5, %6 : vector<128x16xf32>
    %c0_6 = arith.constant 0 : index
    %c0_7 = arith.constant 0 : index
    %c0_8 = arith.constant 0 : index
    %8 = vector.load %arg4[%c0_6, %c0_7, %c0_8] : memref<2x128x128xf32, #tpu.memory_space<vmem>>, vector<1x128x128xf32>
    %9 = vector.shape_cast %8 : vector<1x128x128xf32> to vector<128x128xf32>
    %cst_9 = arith.constant dense<0.000000e+00> : vector<128x16xf32>
    %10 = tpu.matmul %9, %7, %cst_9 {dimension_numbers = #tpu.dot_dimension_numbers<[1], [0], [0], [1], [0, 0, 1, 1], [], []>} : vector<128x128xf32>, vector<128x16xf32>, vector<128x16xf32> -> vector<128x16xf32>
    %c0_10 = arith.constant 0 : index
    %c0_11 = arith.constant 0 : index
    %c0_12 = arith.constant 0 : index
    %11 = vector.load %arg5[%c0_10, %c0_11, %c0_12] : memref<2x128x1xf32, #tpu.memory_space<vmem>>, vector<1x128x1xf32>
    %12 = vector.shape_cast %11 : vector<1x128x1xf32> to vector<128x1xf32>
    %13 = vector.broadcast %12 : vector<128x1xf32> to vector<128x16xf32>
    %14 = arith.addf %10, %13 : vector<128x16xf32>
    %cst_13 = arith.constant 0.000000e+00 : f32
    %15 = vector.broadcast %cst_13 : f32 to vector<128x16xf32>
    %16 = arith.maximumf %14, %15 : vector<128x16xf32>
    %c1 = arith.constant 1 : index
    %c0_14 = arith.constant 0 : index
    %c0_15 = arith.constant 0 : index
    %17 = vector.load %arg4[%c1, %c0_14, %c0_15] : memref<2x128x128xf32, #tpu.memory_space<vmem>>, vector<1x128x128xf32>
    %18 = vector.shape_cast %17 : vector<1x128x128xf32> to vector<128x128xf32>
    %cst_16 = arith.constant dense<0.000000e+00> : vector<128x16xf32>
    %19 = tpu.matmul %18, %16, %cst_16 {dimension_numbers = #tpu.dot_dimension_numbers<[1], [0], [0], [1], [0, 0, 1, 1], [], []>} : vector<128x128xf32>, vector<128x16xf32>, vector<128x16xf32> -> vector<128x16xf32>
    %c1_17 = arith.constant 1 : index
    %c0_18 = arith.constant 0 : index
    %c0_19 = arith.constant 0 : index
    %20 = vector.load %arg5[%c1_17, %c0_18, %c0_19] : memref<2x128x1xf32, #tpu.memory_space<vmem>>, vector<1x128x1xf32>
    %21 = vector.shape_cast %20 : vector<1x128x1xf32> to vector<128x1xf32>
    %22 = vector.broadcast %21 : vector<128x1xf32> to vector<128x16xf32>
    %23 = arith.addf %19, %22 : vector<128x16xf32>
    %cst_20 = arith.constant 0.000000e+00 : f32
    %24 = vector.broadcast %cst_20 : f32 to vector<128x16xf32>
    %25 = arith.maximumf %23, %24 : vector<128x16xf32>
    %cst_21 = arith.constant dense<0.000000e+00> : vector<16xf32>
    %26 = vector.multi_reduction <add>, %25, %cst_21 [0] : vector<128x16xf32> to vector<16xf32>
    %27 = vector.shape_cast %26 : vector<16xf32> to vector<1x16xf32>
    %cst_22 = arith.constant 5.000000e-01 : f32
    %28 = vector.broadcast %cst_22 : f32 to vector<1x16xf32>
    %29 = arith.mulf %28, %27 : vector<1x16xf32>
    %cst_23 = arith.constant 5.000000e-01 : f32
    %30 = vector.broadcast %cst_23 : f32 to vector<1x16xf32>
    %31 = arith.addf %29, %30 : vector<1x16xf32>
    %32 = arith.negf %31 : vector<1x16xf32>
    %33 = math.exp %32 : vector<1x16xf32>
    %cst_24 = arith.constant 1.000000e+00 : f32
    %34 = vector.broadcast %cst_24 : f32 to vector<1x16xf32>
    %35 = arith.addf %34, %33 : vector<1x16xf32>
    %36 = arith.divf %34, %35 : vector<1x16xf32>
    %c0_25 = arith.constant 0 : index
    %c0_26 = arith.constant 0 : index
    %37 = vector.load %arg6[%c0_25, %c0_26] : memref<1x16xf32, #tpu.memory_space<vmem>>, vector<1x16xf32>
    tpu.vector_store %arg6[%c0_25, %c0_26], %36 {strides = array<i32>} : memref<1x16xf32, #tpu.memory_space<vmem>>, vector<1x16xf32>,
    return
  }
  func.func @transform_0(%arg0: i32) -> (i32, i32) {
    %c0_i32 = arith.constant 0 : i32
    %c0_i32_0 = arith.constant 0 : i32
    return %arg0, %c0_i32 : i32, i32
  }
  func.func @transform_1(%arg0: i32) -> (i32, i32) {
    %c0_i32 = arith.constant 0 : i32
    %c0_i32_0 = arith.constant 0 : i32
    %c0_i32_1 = arith.constant 0 : i32
    return %c0_i32, %c0_i32_0 : i32, i32
  }
  func.func @transform_2(%arg0: i32) -> (i32, i32) {
    %c0_i32 = arith.constant 0 : i32
    %c0_i32_0 = arith.constant 0 : i32
    %c0_i32_1 = arith.constant 0 : i32
    return %c0_i32, %c0_i32_0 : i32, i32
  }
  func.func @transform_3(%arg0: i32) -> (i32, i32, i32) {
    %c0_i32 = arith.constant 0 : i32
    %c0_i32_0 = arith.constant 0 : i32
    %c0_i32_1 = arith.constant 0 : i32
    %c0_i32_2 = arith.constant 0 : i32
    return %c0_i32, %c0_i32_0, %c0_i32_1 : i32, i32, i32
  }
  func.func @transform_4(%arg0: i32) -> (i32, i32, i32) {
    %c0_i32 = arith.constant 0 : i32
    %c0_i32_0 = arith.constant 0 : i32
    %c0_i32_1 = arith.constant 0 : i32
    %c0_i32_2 = arith.constant 0 : i32
    return %c0_i32, %c0_i32_0, %c0_i32_1 : i32, i32, i32
  }
  func.func @transform_5(%arg0: i32) -> (i32, i32) {
    %c0_i32 = arith.constant 0 : i32
    %c0_i32_0 = arith.constant 0 : i32
    return %c0_i32, %arg0 : i32, i32
  }
}

module attributes {stable_mosaic.version = 11 : i64} {
  func.func @_mlp_kernel(%arg0: i32, %arg1: memref<16x16xf32, #tpu.memory_space<vmem>>, %arg2: memref<128x16xf32, #tpu.memory_space<vmem>>, %arg3: memref<128x1xf32, #tpu.memory_space<vmem>>, %arg4: memref<2x128x128xf32, #tpu.memory_space<vmem>>, %arg5: memref<2x128x1xf32, #tpu.memory_space<vmem>>, %arg6: memref<1x16xf32, #tpu.memory_space<vmem>>) attributes {dimension_semantics = [#tpu.dimension_semantics<parallel>], iteration_bounds = array<i64: 1>, scalar_prefetch = 0 : i64, scratch_operands = 0 : i64, tpu.core_type = #tpu.core_type<tc>, window_params = [{transform_indices = @transform_0, window_bounds = array<i64: 16, 16>}, {pipeline_mode = #tpu.pipeline_mode<synchronous>, transform_indices = @transform_1, window_bounds = array<i64: 128, 16>}, {pipeline_mode = #tpu.pipeline_mode<synchronous>, transform_indices = @transform_2, window_bounds = array<i64: 128, 1>}, {pipeline_mode = #tpu.pipeline_mode<synchronous>, transform_indices = @transform_3, window_bounds = array<i64: 2, 128, 128>}, {pipeline_mode = #tpu.pipeline_mode<synchronous>, transform_indices = @transform_4, window_bounds = array<i64: 2, 128, 1>}, {transform_indices = @transform_5, window_bounds = array<i64: 1, 16>}]} {
    %c0 = arith.constant 0 : index
    %c0_0 = arith.constant 0 : index
    %0 = vector.load %arg1[%c0, %c0_0] : memref<16x16xf32, #tpu.memory_space<vmem>>, vector<16x16xf32>
    %c0_1 = arith.constant 0 : index
    %c0_2 = arith.constant 0 : index
    %1 = vector.load %arg2[%c0_1, %c0_2] : memref<128x16xf32, #tpu.memory_space<vmem>>, vector<128x16xf32>
    %cst = arith.constant dense<0.000000e+00> : vector<128x16xf32>
    %2 = tpu.matmul %1, %0, %cst {dimension_numbers = #tpu.dot_dimension_numbers<[1], [1], [0], [0], [0, 0, 1, 0], [], []>} : vector<128x16xf32>, vector<16x16xf32>, vector<128x16xf32> -> vector<128x16xf32>
    %c0_3 = arith.constant 0 : index
    %c0_4 = arith.constant 0 : index
    %3 = vector.load %arg3[%c0_3, %c0_4] : memref<128x1xf32, #tpu.memory_space<vmem>>, vector<128x1xf32>
    %4 = vector.broadcast %3 : vector<128x1xf32> to vector<128x16xf32>
    %5 = arith.addf %2, %4 : vector<128x16xf32>
    %cst_5 = arith.constant 0.000000e+00 : f32
    %6 = vector.broadcast %cst_5 : f32 to vector<128x16xf32>
    %7 = arith.maximumf %5, %6 : vector<128x16xf32>
    %c0_6 = arith.constant 0 : index
    %c0_7 = arith.constant 0 : index
    %c0_8 = arith.constant 0 : index
    %8 = vector.load %arg4[%c0_6, %c0_7, %c0_8] : memref<2x128x128xf32, #tpu.memory_space<vmem>>, vector<1x128x128xf32>
    %9 = vector.shape_cast %8 : vector<1x128x128xf32> to vector<128x128xf32>
    %cst_9 = arith.constant dense<0.000000e+00> : vector<128x16xf32>
    %10 = tpu.matmul %9, %7, %cst_9 {dimension_numbers = #tpu.dot_dimension_numbers<[1], [0], [0], [1], [0, 0, 1, 1], [], []>} : vector<128x128xf32>, vector<128x16xf32>, vector<128x16xf32> -> vector<128x16xf32>
    %c0_10 = arith.constant 0 : index
    %c0_11 = arith.constant 0 : index
    %c0_12 = arith.constant 0 : index
    %11 = vector.load %arg5[%c0_10, %c0_11, %c0_12] : memref<2x128x1xf32, #tpu.memory_space<vmem>>, vector<1x128x1xf32>
    %12 = vector.shape_cast %11 : vector<1x128x1xf32> to vector<128x1xf32>
    %13 = vector.broadcast %12 : vector<128x1xf32> to vector<128x16xf32>
    %14 = arith.addf %10, %13 : vector<128x16xf32>
    %cst_13 = arith.constant 0.000000e+00 : f32
    %15 = vector.broadcast %cst_13 : f32 to vector<128x16xf32>
    %16 = arith.maximumf %14, %15 : vector<128x16xf32>
    %c1 = arith.constant 1 : index
    %c0_14 = arith.constant 0 : index
    %c0_15 = arith.constant 0 : index
    %17 = vector.load %arg4[%c1, %c0_14, %c0_15] : memref<2x128x128xf32, #tpu.memory_space<vmem>>, vector<1x128x128xf32>
    %18 = vector.shape_cast %17 : vector<1x128x128xf32> to vector<128x128xf32>
    %cst_16 = arith.constant dense<0.000000e+00> : vector<128x16xf32>
    %19 = tpu.matmul %18, %16, %cst_16 {dimension_numbers = #tpu.dot_dimension_numbers<[1], [0], [0], [1], [0, 0, 1, 1], [], []>} : vector<128x128xf32>, vector<128x16xf32>, vector<128x16xf32> -> vector<128x16xf32>
    %c1_17 = arith.constant 1 : index
    %c0_18 = arith.constant 0 : index
    %c0_19 = arith.constant 0 : index
    %20 = vector.load %arg5[%c1_17, %c0_18, %c0_19] : memref<2x128x1xf32, #tpu.memory_space<vmem>>, vector<1x128x1xf32>
    %21 = vector.shape_cast %20 : vector<1x128x1xf32> to vector<128x1xf32>
    %22 = vector.broadcast %21 : vector<128x1xf32> to vector<128x16xf32>
    %23 = arith.addf %19, %22 : vector<128x16xf32>
    %cst_20 = arith.constant 0.000000e+00 : f32
    %24 = vector.broadcast %cst_20 : f32 to vector<128x16xf32>
    %25 = arith.maximumf %23, %24 : vector<128x16xf32>
    %cst_21 = arith.constant dense<0.000000e+00> : vector<16xf32>
    %26 = vector.multi_reduction <add>, %25, %cst_21 [0] : vector<128x16xf32> to vector<16xf32>
    %27 = vector.shape_cast %26 : vector<16xf32> to vector<1x16xf32>
    %cst_22 = arith.constant 5.000000e-01 : f32
    %28 = vector.broadcast %cst_22 : f32 to vector<1x16xf32>
    %29 = arith.mulf %28, %27 : vector<1x16xf32>
    %cst_23 = arith.constant 5.000000e-01 : f32
    %30 = vector.broadcast %cst_23 : f32 to vector<1x16xf32>
    %31 = arith.addf %29, %30 : vector<1x16xf32>
    %32 = arith.negf %31 : vector<1x16xf32>
    %33 = math.exp %32 : vector<1x16xf32>
    %cst_24 = arith.constant 1.000000e+00 : f32
    %34 = vector.broadcast %cst_24 : f32 to vector<1x16xf32>
    %35 = arith.addf %34, %33 : vector<1x16xf32>
    %36 = arith.divf %34, %35 : vector<1x16xf32>
    %c0_25 = arith.constant 0 : index
    %c0_26 = arith.constant 0 : index
    %37 = vector.load %arg6[%c0_25, %c0_26] : memref<1x16xf32, #tpu.memory_space<vmem>>, vector<1x16xf32>
    tpu.vector_store %arg6[%c0_25, %c0_26], %36 {strides = array<i32>} : memref<1x16xf32, #tpu.memory_space<vmem>>, vector<1x16xf32>,
    return
  }
  func.func @transform_0(%arg0: i32) -> (i32, i32) {
    %c0_i32 = arith.constant 0 : i32
    %c0_i32_0 = arith.constant 0 : i32
    return %arg0, %c0_i32 : i32, i32
  }
  func.func @transform_1(%arg0: i32) -> (i32, i32) {
    %c0_i32 = arith.constant 0 : i32
    %c0_i32_0 = arith.constant 0 : i32
    %c0_i32_1 = arith.constant 0 : i32
    return %c0_i32, %c0_i32_0 : i32, i32
  }
  func.func @transform_2(%arg0: i32) -> (i32, i32) {
    %c0_i32 = arith.constant 0 : i32
    %c0_i32_0 = arith.constant 0 : i32
    %c0_i32_1 = arith.constant 0 : i32
    return %c0_i32, %c0_i32_0 : i32, i32
  }
  func.func @transform_3(%arg0: i32) -> (i32, i32, i32) {
    %c0_i32 = arith.constant 0 : i32
    %c0_i32_0 = arith.constant 0 : i32
    %c0_i32_1 = arith.constant 0 : i32
    %c0_i32_2 = arith.constant 0 : i32
    return %c0_i32, %c0_i32_0, %c0_i32_1 : i32, i32, i32
  }
  func.func @transform_4(%arg0: i32) -> (i32, i32, i32) {
    %c0_i32 = arith.constant 0 : i32
    %c0_i32_0 = arith.constant 0 : i32
    %c0_i32_1 = arith.constant 0 : i32
    %c0_i32_2 = arith.constant 0 : i32
    return %c0_i32, %c0_i32_0, %c0_i32_1 : i32, i32, i32
  }
  func.func @transform_5(%arg0: i32) -> (i32, i32) {
    %c0_i32 = arith.constant 0 : i32
    %c0_i32_0 = arith.constant 0 : i32
    return %c0_i32, %arg0 : i32, i32
  }
}

</mosaic_0001>

<bundles_post_ra>
// kernel: tpu_custom_call.1
= control target key start
LH: loop header
LB: loop body
LE: loop exit
PB: predicated region body
PF: predicated region fallthrough
CT: control target
= control target key end

     0   :  { %vm135_vm0 = vcmask 130048   ;;  %v1295_v4 = vmov 0   ;;  %s1690_s0 = inlined_call_operand.vmem [shape: f32[16,16], index: 0, kind: input, shape index: {}]   ;;  %s1691_s1 = inlined_call_operand.vmem [shape: f32[128,16], index: 1, kind: input, shape index: {}]   ;;  %s1692_s2 = inlined_call_operand.vmem [shape: f32[128,1], index: 2, kind: input, shape index: {}]   ;;  %s1693_s3 = inlined_call_operand.vmem [shape: f32[2,128,128], index: 3, kind: input, shape index: {}]   ;;  %s1694_s4 = inlined_call_operand.vmem [shape: f32[2,128,1], index: 4, kind: input, shape index: {}]   ;;  %s1695_s5 = inlined_call_operand.hbm [shape: f32[1,16], index: 5, kind: output, shape index: {}]  }
   0x1   :  { %v22_v0 = vld [vmem:[%s1690_s0 + $0x8] sm:$0xff]  ;;  %v21_v1 = vld [vmem:[%s1690_s0] sm:$0xff]  ;;  %v54_v3 = vld [vmem:[%s1692_s2 + $0x78] sm:$0xff]  ;;  %1267 = vset.pattern.permute.xlu0 %v1295_v4  ;;  %1268 = vset.pattern.permute.xlu1 %v1295_v4 }
   0x2   :  { %v23_v2 = vld [vmem:[%s1691_s1] sm:$0xff]  ;;  %1093 = vmatprep.subr.msk.mxu0 %vm135_vm0, %v22_v0  ;;  %v52_v5 = vld [vmem:[%s1692_s2 + $0x68] sm:$0xff]  ;;  %132 = vperm.xlu0 %1267, %v54_v3   ;;  %v53_v6 = vld [vmem:[%s1692_s2 + $0x70] sm:$0xff] }
   0x3   :  { %1097 = vmatprep.mubr.msk.f32.mxu0 %vm135_vm0, %v23_v2  ;;  %1094 = vmatpush3.xpose.msk.msra.mxu0 %vm135_vm0, %v22_v0  ;;  %v24_v7 = vld [vmem:[%s1691_s1 + $0x8] sm:$0xff]  ;;  %v51_v8 = vld [vmem:[%s1692_s2 + $0x60] sm:$0xff]  ;;  %v25_v9 = vld [vmem:[%s1691_s1 + $0x10] sm:$0xff] }
   0x4   :  { %1095 = vmatprep.subr.msk.mxu0 %vm135_vm0, %v21_v1  ;;  %122 = vperm.xlu1 %1268, %v52_v5   ;;  %v50_v10 = vld [vmem:[%s1692_s2 + $0x58] sm:$0xff]  ;;  %v49_v12 = vld [vmem:[%s1692_s2 + $0x50] sm:$0xff]  ;;  %v27_v13 = vld [vmem:[%s1691_s1 + $0x20] sm:$0xff] }
   0x5   :  { %v26_v11 = vld [vmem:[%s1691_s1 + $0x18] sm:$0xff]  ;;  %v48_v14 = vld [vmem:[%s1692_s2 + $0x48] sm:$0xff]  ;;  %v47_v16 = vld [vmem:[%s1692_s2 + $0x40] sm:$0xff] }
   0x6   :  { %127 = vperm.xlu0 %1267, %v53_v6   ;;  %v28_v15 = vld [vmem:[%s1691_s1 + $0x28] sm:$0xff]  ;;  %v29_v17 = vld [vmem:[%s1691_s1 + $0x30] sm:$0xff]  ;;  %v46_v18 = vld [vmem:[%s1692_s2 + $0x38] sm:$0xff] }
   0x7   :  { %1096 = vmatpush3.xpose.msk.msra.mxu0 %vm135_vm0, %v21_v1  ;;  %v30_v19 = vld [vmem:[%s1691_s1 + $0x38] sm:$0xff]  ;;  %v45_v20 = vld [vmem:[%s1692_s2 + $0x30] sm:$0xff]  ;;  %v31_v21 = vld [vmem:[%s1691_s1 + $0x40] sm:$0xff] }
   0x8   :  { %117 = vperm.xlu1 %1268, %v51_v8   ;;  %v44_v22 = vld [vmem:[%s1692_s2 + $0x28] sm:$0xff]  ;;  %v43_v24 = vld [vmem:[%s1692_s2 + $0x20] sm:$0xff] }
   0x9   :  { %v32_v23 = vld [vmem:[%s1691_s1 + $0x48] sm:$0xff] }
   0xa   :  { %1098 = vmatmul.mubr.msk.f32.vlgmr.msra.gmra.mxu0 %vm135_vm0, %v24_v7  ;;  %112 = vperm.xlu0 %1267, %v50_v10  }
   0xb   :  { %1100 = vmatprep.mubr.msk.f32.mxu0 %vm135_vm0, %v25_v9 }
   0xc   :  { %107 = vperm.xlu1 %1268, %v49_v12  }
   0xe   :  { %1101 = vmatmul.mubr.msk.f32.gmra.mxu0 %vm135_vm0, %v26_v11  ;;  %102 = vperm.xlu0 %1267, %v48_v14  }
   0xf   :  { %1103 = vmatprep.mubr.msk.f32.mxu0 %vm135_vm0, %v27_v13 }
  0x10   :  { %97 = vperm.xlu1 %1268, %v47_v16  }
  0x12   :  { %1104 = vmatmul.mubr.msk.f32.gmra.mxu0 %vm135_vm0, %v28_v15  ;;  %92 = vperm.xlu0 %1267, %v46_v18  }
  0x13   :  { %1106 = vmatprep.mubr.msk.f32.mxu0 %vm135_vm0, %v29_v17 }
  0x14   :  { %87 = vperm.xlu1 %1268, %v45_v20  }
  0x16   :  { %1107 = vmatmul.mubr.msk.f32.gmra.mxu0 %vm135_vm0, %v30_v19 }
  0x17   :  { %1109 = vmatprep.mubr.msk.f32.mxu0 %vm135_vm0, %v31_v21 }
  0x18   :  { %10 = vsyncpa [#allocation3], 0  ;;  %v33_v25 = vld [vmem:[%s1691_s1 + $0x50] sm:$0xff]  ;;  %82 = vperm.xlu0 %1267, %v44_v22   ;;  %v42_v26 = vld [vmem:[%s1692_s2 + $0x18] sm:$0xff]  ;;  %77 = vperm.xlu1 %1268, %v43_v24   ;;  %vm944_vm1 = vcmask 122880  }
  0x19   :  { %v34_v27 = vld [vmem:[%s1691_s1 + $0x58] sm:$0xff]  ;;  %v41_v28 = vld [vmem:[%s1692_s2 + $0x10] sm:$0xff]  ;;  %v35_v29 = vld [vmem:[%s1691_s1 + $0x60] sm:$0xff] }
  0x1a   :  { %1110 = vmatmul.mubr.msk.f32.gmra.mxu0 %vm135_vm0, %v32_v23  ;;  %v40_v30 = vld [vmem:[%s1692_s2 + $0x8] sm:$0xff]  ;;  %v39_v32 = vld [vmem:[%s1692_s2] sm:$0xff]  ;;  %v37_v33 = vld [vmem:[%s1691_s1 + $0x70] sm:$0xff] }
  0x1b   :  { %1112 = vmatprep.mubr.msk.f32.mxu0 %vm135_vm0, %v33_v25  ;;  %v36_v31 = vld [vmem:[%s1691_s1 + $0x68] sm:$0xff]  ;;  %v382_v34 = vld [vmem:[%s1694_s4 + $0x78] sm:$0xff]  ;;  %v381_v36 = vld [vmem:[%s1694_s4 + $0x70] sm:$0xff] }
  0x1c   :  { %72 = vperm.xlu0 %1267, %v42_v26   ;;  %67 = vperm.xlu1 %1268, %v41_v28   ;;  %v38_v35 = vld [vmem:[%s1691_s1 + $0x78] sm:$0xff]  ;;  %v380_v37 = vld [vmem:[%s1694_s4 + $0x68] sm:$0xff]  ;;  %v379_v38 = vld [vmem:[%s1694_s4 + $0x60] sm:$0xff] }
  0x1d   :  { %v378_v39 = vld [vmem:[%s1694_s4 + $0x58] sm:$0xff]  ;;  %v377_v40 = vld [vmem:[%s1694_s4 + $0x50] sm:$0xff]  ;;  %v376_v41 = vld [vmem:[%s1694_s4 + $0x48] sm:$0xff] }
  0x1e   :  { %1113 = vmatmul.mubr.msk.f32.gmra.mxu0 %vm135_vm0, %v34_v27  ;;  %v375_v42 = vld [vmem:[%s1694_s4 + $0x40] sm:$0xff]  ;;  %v374_v43 = vld [vmem:[%s1694_s4 + $0x38] sm:$0xff]  ;;  %v373_v44 = vld [vmem:[%s1694_s4 + $0x30] sm:$0xff] }
  0x1f   :  { %1115 = vmatprep.mubr.msk.f32.mxu0 %vm135_vm0, %v35_v29  ;;  %v372_v45 = vld [vmem:[%s1694_s4 + $0x28] sm:$0xff]  ;;  %v371_v46 = vld [vmem:[%s1694_s4 + $0x20] sm:$0xff]  ;;  %v370_v47 = vld [vmem:[%s1694_s4 + $0x18] sm:$0xff] }
  0x20   :  { %62 = vperm.xlu0 %1267, %v40_v30   ;;  %57 = vperm.xlu1 %1268, %v39_v32   ;;  %v369_v48 = vld [vmem:[%s1694_s4 + $0x10] sm:$0xff]  ;;  %v368_v49 = vld [vmem:[%s1694_s4 + $0x8] sm:$0xff]  ;;  %v367_v50 = vld [vmem:[%s1694_s4] sm:$0xff] }
  0x21   :  { %v994_v51 = vld [vmem:[%s1694_s4 + $0x80] sm:$0xff]  ;;  %v995_v52 = vld [vmem:[%s1694_s4 + $0x88] sm:$0xff]  ;;  %v996_v53 = vld [vmem:[%s1694_s4 + $0x90] sm:$0xff] }
  0x22   :  { %1116 = vmatmul.mubr.msk.f32.gmra.mxu0 %vm135_vm0, %v36_v31  ;;  %v997_v54 = vld [vmem:[%s1694_s4 + $0x98] sm:$0xff]  ;;  %v998_v55 = vld [vmem:[%s1694_s4 + $0xa0] sm:$0xff]  ;;  %v999_v56 = vld [vmem:[%s1694_s4 + $0xa8] sm:$0xff] }
  0x23   :  { %1118 = vmatprep.mubr.msk.f32.mxu0 %vm135_vm0, %v37_v33  ;;  %v1000_v57 = vld [vmem:[%s1694_s4 + $0xb0] sm:$0xff]  ;;  %v1001_v58 = vld [vmem:[%s1694_s4 + $0xb8] sm:$0xff]  ;;  %v1002_v59 = vld [vmem:[%s1694_s4 + $0xc0] sm:$0xff] }
  0x24   :  { %460 = vperm.xlu0 %1267, %v382_v34   ;;  %455 = vperm.xlu1 %1268, %v381_v36   ;;  %v1003_v60 = vld [vmem:[%s1694_s4 + $0xc8] sm:$0xff]  ;;  %v1004_v61 = vld [vmem:[%s1694_s4 + $0xd0] sm:$0xff]  ;;  %v1005_v62 = vld [vmem:[%s1694_s4 + $0xd8] sm:$0xff] }
  0x25   :  { %v1006_v63 = vld [vmem:[%s1694_s4 + $0xe0] sm:$0xff]  ;;  %v1007_v0 = vld [vmem:[%s1694_s4 + $0xe8] sm:$0xff]  ;;  %v1008_v1 = vld [vmem:[%s1694_s4 + $0xf0] sm:$0xff] }
  0x26   :  { %1119 = vmatmul.mubr.msk.f32.gmra.mxu0 %vm135_vm0, %v38_v35  ;;  %v1009_v2 = vld [vmem:[%s1694_s4 + $0xf8] sm:$0xff]  ;;  %v351_v3 = vld [vmem:[%s1693_s3] sm:$0xff] }
  0x27   :  { %1153 = vmatprep.mubr.f32.mxu1 %v351_v3 }
  0x28   :  { %450 = vperm.xlu0 %1267, %v380_v37   ;;  %445 = vperm.xlu1 %1268, %v379_v38  }
  0x2c   :  { %440 = vperm.xlu0 %1267, %v378_v39   ;;  %435 = vperm.xlu1 %1268, %v377_v40  }
  0x30   :  { %430 = vperm.xlu0 %1267, %v376_v41   ;;  %425 = vperm.xlu1 %1268, %v375_v42  }
  0x34   :  { %420 = vperm.xlu0 %1267, %v374_v43   ;;  %415 = vperm.xlu1 %1268, %v373_v44  }
  0x38   :  { %410 = vperm.xlu0 %1267, %v372_v45   ;;  %405 = vperm.xlu1 %1268, %v371_v46  }
  0x3c   :  { %400 = vperm.xlu0 %1267, %v370_v47   ;;  %395 = vperm.xlu1 %1268, %v369_v48  }
  0x40   :  { %390 = vperm.xlu0 %1267, %v368_v49   ;;  %385 = vperm.xlu1 %1268, %v367_v50  }
  0x44   :  { %660 = vperm.xlu0 %1267, %v994_v51   ;;  %665 = vperm.xlu1 %1268, %v995_v52  }
  0x48   :  { %670 = vperm.xlu0 %1267, %v996_v53   ;;  %675 = vperm.xlu1 %1268, %v997_v54  }
  0x4c   :  { %680 = vperm.xlu0 %1267, %v998_v55   ;;  %685 = vperm.xlu1 %1268, %v999_v56  }
  0x50   :  { %690 = vperm.xlu0 %1267, %v1000_v57   ;;  %695 = vperm.xlu1 %1268, %v1001_v58  }
  0x54   :  { %700 = vperm.xlu0 %1267, %v1002_v59   ;;  %705 = vperm.xlu1 %1268, %v1003_v60  }
  0x58   :  { %710 = vperm.xlu0 %1267, %v1004_v61   ;;  %715 = vperm.xlu1 %1268, %v1005_v62  }
  0x5c   :  { %720 = vperm.xlu0 %1267, %v1006_v63   ;;  %725 = vperm.xlu1 %1268, %v1007_v0  }
  0x60   :  { %730 = vperm.xlu0 %1267, %v1008_v1   ;;  %735 = vperm.xlu1 %1268, %v1009_v2  }
  0x7d   :  { %v133_v10 = vpop.permute.xlu0 %132 }
  0x7f   :  { %v123_v12 = vpop.permute.xlu1 %122 }
  0x81   :  { %v128_v15 = vpop.permute.xlu0 %127 }
  0x83   :  { %v118_v17 = vpop.permute.xlu1 %117 }
  0x85   :  { %v113_v20 = vpop.permute.xlu0 %112 }
  0x87   :  { %v108_v22 = vpop.permute.xlu1 %107 }
  0x89   :  { %v103_v26 = vpop.permute.xlu0 %102 }
  0x8b   :  { %v98_v31 = vpop.permute.xlu1 %97 }
  0x8d   :  { %v93_v36 = vpop.permute.xlu0 %92 }
  0x8f   :  { %v88_v39 = vpop.permute.xlu1 %87 }
  0x93   :  { %v83_v44 = vpop.permute.xlu0 %82  ;;  %v78_v47 = vpop.permute.xlu1 %77 }
  0x97   :  { %v73_v52 = vpop.permute.xlu0 %72  ;;  %v68_v55 = vpop.permute.xlu1 %67 }
  0x9b   :  { %v63_v60 = vpop.permute.xlu0 %62  ;;  %v58_v63 = vpop.permute.xlu1 %57 }
  0xca   :  { %v1548_v4 = vpop.f32.mrf.mxu0 }
  0xcb   :  { %v262_v61 = vadd.f32 %v1548_v4, %v63_v60  ;;  %v353_v4 = vld [vmem:[%s1693_s3 + $0x10] sm:$0xff] }
  0xcc   :  { %v1550_v5 = vpop.f32.mrf.mxu0 }
  0xcd   :  { %v257_v0 = vadd.f32 %v1550_v5, %v58_v63  ;;  %v336_v2 = vmax.f32 %v262_v61, 0.0  ;;  %v354_v5 = vld [vmem:[%s1693_s3 + $0x18] sm:$0xff] }
  0xce   :  { %v1552_v6 = vpop.f32.mrf.mxu0 }
  0xcf   :  { %v272_v56 = vadd.f32 %v1552_v6, %v73_v52  ;;  %v335_v3 = vmax.f32 %v257_v0, 0.0  ;;  %v352_v6 = vld [vmem:[%s1693_s3 + $0x8] sm:$0xff] }
  0xd0   :  { %v1554_v7 = vpop.f32.mrf.mxu0 }
  0xd1   :  { %v267_v58 = vadd.f32 %v1554_v7, %v68_v55  ;;  %v338_v62 = vmax.f32 %v272_v56, 0.0  ;;  %v355_v7 = vld [vmem:[%s1693_s3 + $0x20] sm:$0xff] }
  0xd2   :  { %v1105_v8 = vpop.f32.mrf.mxu0 }
  0xd3   :  { %v282_v50 = vadd.f32 %v1105_v8, %v83_v44  ;;  %v337_v1 = vmax.f32 %v267_v58, 0.0  ;;  %v356_v8 = vld [vmem:[%s1693_s3 + $0x28] sm:$0xff] }
  0xd4   :  { %v276_v9 = vpop.f32.mrf.mxu0 }
  0xd5   :  { %v277_v53 = vadd.f32 %v276_v9, %v78_v47  ;;  %v340_v57 = vmax.f32 %v282_v50, 0.0  ;;  %v357_v9 = vld [vmem:[%s1693_s3 + $0x30] sm:$0xff] }
  0xd6   :  { %v1108_v11 = vpop.f32.mrf.mxu0 }
  0xd7   :  { %v292_v45 = vadd.f32 %v1108_v11, %v93_v36  ;;  %v339_v59 = vmax.f32 %v277_v53, 0.0  ;;  %v359_v11 = vld [vmem:[%s1693_s3 + $0x40] sm:$0xff] }
  0xd8   :  { %v286_v13 = vpop.f32.mrf.mxu0 }
  0xd9   :  { %v287_v48 = vadd.f32 %v286_v13, %v88_v39  ;;  %v342_v51 = vmax.f32 %v292_v45, 0.0  ;;  %v361_v13 = vld [vmem:[%s1693_s3 + $0x50] sm:$0xff] }
  0xda   :  { %v1111_v14 = vpop.f32.mrf.mxu0 }
  0xdb   :  { %v302_v40 = vadd.f32 %v1111_v14, %v103_v26  ;;  %v341_v54 = vmax.f32 %v287_v48, 0.0  ;;  %v362_v14 = vld [vmem:[%s1693_s3 + $0x58] sm:$0xff] }
  0xdc   :  { %v296_v16 = vpop.f32.mrf.mxu0 }
  0xdd   :  { %v297_v42 = vadd.f32 %v296_v16, %v98_v31  ;;  %v344_v46 = vmax.f32 %v302_v40, 0.0  ;;  %v364_v16 = vld [vmem:[%s1693_s3 + $0x68] sm:$0xff] }
  0xde   :  { %v1114_v18 = vpop.f32.mrf.mxu0 }
  0xdf   :  { %v312_v34 = vadd.f32 %v1114_v18, %v113_v20  ;;  %v343_v49 = vmax.f32 %v297_v42, 0.0  ;;  %v366_v18 = vld [vmem:[%s1693_s3 + $0x78] sm:$0xff]  ;;  %v992_v20 = vld [vmem:[%s1693_s3 + $0xf0] sm:$0xff] }
  0xe0   :  { %v306_v19 = vpop.f32.mrf.mxu0 }
  0xe1   :  { %v307_v37 = vadd.f32 %v306_v19, %v108_v22  ;;  %v346_v41 = vmax.f32 %v312_v34, 0.0  ;;  %v978_v19 = vld [vmem:[%s1693_s3 + $0x80] sm:$0xff] }
  0xe2   :  { %v1117_v21 = vpop.f32.mrf.mxu0  ;;  %1209 = vmatprep.mubr.f32.mxu0 %v978_v19 }
  0xe3   :  { %v322_v28 = vadd.f32 %v1117_v21, %v123_v12  ;;  %v345_v43 = vmax.f32 %v307_v37, 0.0  ;;  %v360_v12 = vld [vmem:[%s1693_s3 + $0x48] sm:$0xff] }
  0xe4   :  { %v316_v23 = vpop.f32.mrf.mxu0 }
  0xe5   :  { %v317_v32 = vadd.f32 %v316_v23, %v118_v17  ;;  %v348_v35 = vmax.f32 %v322_v28, 0.0  ;;  %v365_v17 = vld [vmem:[%s1693_s3 + $0x70] sm:$0xff] }
  0xe6   :  { %v1120_v24 = vpop.f32.mrf.mxu0 }
  0xe7   :  { %v332_v25 = vadd.f32 %v1120_v24, %v133_v10  ;;  %v347_v38 = vmax.f32 %v317_v32, 0.0  ;;  %v358_v10 = vld [vmem:[%s1693_s3 + $0x38] sm:$0xff] }
  0xe8   :  { %v326_v27 = vpop.f32.mrf.mxu0 }
  0xe9   :  { %v350_v29 = vmax.f32 %v332_v25, 0.0  ;;  %v327_v30 = vadd.f32 %v326_v27, %v128_v15  ;;  %v363_v15 = vld [vmem:[%s1693_s3 + $0x60] sm:$0xff]  ;;  %v461_v27 = vpop.permute.xlu0 %460 }
  0xeb   :  { %v349_v33 = vmax.f32 %v327_v30, 0.0  ;;  %1121 = vmatprep.subr.mxu1 %v350_v29 }
  0xec   :  { %1122 = vmatpush3.msra.mxu1 %v350_v29  ;;  %v456_v29 = vpop.permute.xlu1 %455 }
  0xed   :  { %1123 = vmatprep.subr.mxu1 %v349_v33  ;;  %v451_v32 = vpop.permute.xlu0 %450 }
  0xee   :  { %1124 = vmatpush3.msra.mxu1 %v349_v33 }
  0xef   :  { %1125 = vmatprep.subr.mxu1 %v348_v35 }
  0xf0   :  { %1126 = vmatpush3.msra.mxu1 %v348_v35  ;;  %v446_v34 = vpop.permute.xlu1 %445 }
  0xf1   :  { %1127 = vmatprep.subr.mxu1 %v347_v38  ;;  %v441_v37 = vpop.permute.xlu0 %440 }
  0xf2   :  { %1128 = vmatpush3.msra.mxu1 %v347_v38 }
  0xf3   :  { %1129 = vmatprep.subr.mxu1 %v346_v41 }
  0xf4   :  { %1130 = vmatpush3.msra.mxu1 %v346_v41  ;;  %v436_v39 = vpop.permute.xlu1 %435 }
  0xf5   :  { %1131 = vmatprep.subr.mxu1 %v345_v43 }
  0xf6   :  { %1132 = vmatpush3.msra.mxu1 %v345_v43  ;;  %v431_v43 = vpop.permute.xlu0 %430 }
  0xf7   :  { %1133 = vmatprep.subr.mxu1 %v344_v46 }
  0xf8   :  { %1134 = vmatpush3.msra.mxu1 %v344_v46  ;;  %v426_v48 = vpop.permute.xlu1 %425 }
  0xf9   :  { %1135 = vmatprep.subr.mxu1 %v343_v49 }
  0xfa   :  { %1136 = vmatpush3.msra.mxu1 %v343_v49  ;;  %v421_v53 = vpop.permute.xlu0 %420 }
  0xfb   :  { %1137 = vmatprep.subr.mxu1 %v342_v51 }
  0xfc   :  { %1138 = vmatpush3.msra.mxu1 %v342_v51  ;;  %v416_v56 = vpop.permute.xlu1 %415 }
  0xfd   :  { %1139 = vmatprep.subr.mxu1 %v341_v54 }
  0xfe   :  { %1140 = vmatpush3.msra.mxu1 %v341_v54  ;;  %v411_v61 = vpop.permute.xlu0 %410 }
  0xff   :  { %1141 = vmatprep.subr.mxu1 %v340_v57 }
 0x100   :  { %1142 = vmatpush3.msra.mxu1 %v340_v57  ;;  %v406_v0 = vpop.permute.xlu1 %405 }
 0x101   :  { %1143 = vmatprep.subr.mxu1 %v339_v59 }
 0x102   :  { %1144 = vmatpush3.msra.mxu1 %v339_v59 }
 0x103   :  { %1145 = vmatprep.subr.mxu1 %v338_v62 }
 0x104   :  { %1146 = vmatpush3.msra.mxu1 %v338_v62 }
 0x105   :  { %1147 = vmatprep.subr.mxu1 %v337_v1 }
 0x106   :  { %1148 = vmatpush3.msra.mxu1 %v337_v1 }
 0x107   :  { %1149 = vmatprep.subr.mxu1 %v336_v2 }
 0x108   :  { %1150 = vmatpush3.msra.mxu1 %v336_v2 }
 0x109   :  { %1151 = vmatprep.subr.mxu1 %v335_v3 }
 0x10a   :  { %1152 = vmatpush3.msra.mxu1 %v335_v3 }
 0x10b   :  { %1154 = vmatmul.mubr.f32.vlgmr.msra.gmra.mxu1 %v352_v6 }
 0x10c   :  { %1156 = vmatprep.mubr.f32.mxu1 %v353_v4  ;;  %v401_v4 = vpop.permute.xlu0 %400 }
 0x10f   :  { %1157 = vmatmul.mubr.f32.gmra.mxu1 %v354_v5 }
 0x110   :  { %1159 = vmatprep.mubr.f32.mxu1 %v355_v7 }
 0x113   :  { %1160 = vmatmul.mubr.f32.gmra.mxu1 %v356_v8  ;;  %v396_v8 = vpop.permute.xlu1 %395 }
 0x114   :  { %1162 = vmatprep.mubr.f32.mxu1 %v357_v9 }
 0x117   :  { %1163 = vmatmul.mubr.f32.gmra.mxu1 %v358_v10 }
 0x118   :  { %1165 = vmatprep.mubr.f32.mxu1 %v359_v11 }
 0x11b   :  { %1166 = vmatmul.mubr.f32.gmra.mxu1 %v360_v12 }
 0x11c   :  { %1168 = vmatprep.mubr.f32.mxu1 %v361_v13  ;;  %v391_v13 = vpop.permute.xlu0 %390 }
 0x11f   :  { %1169 = vmatmul.mubr.f32.gmra.mxu1 %v362_v14 }
 0x120   :  { %1171 = vmatprep.mubr.f32.mxu1 %v363_v15 }
 0x123   :  { %1172 = vmatmul.mubr.f32.gmra.mxu1 %v364_v16  ;;  %v386_v16 = vpop.permute.xlu1 %385 }
 0x124   :  { %1174 = vmatprep.mubr.f32.mxu1 %v365_v17 }
 0x127   :  { %1175 = vmatmul.mubr.f32.gmra.mxu1 %v366_v18 }
 0x128   :  { %1230 = vmatprep.mubr.f32.mxu1 %v992_v20 }
 0x1cb   :  { %v1611_v21 = vpop.f32.mrf.mxu1 }
 0x1cc   :  { %v535_v14 = vadd.f32 %v1611_v21, %v391_v13  ;;  %v979_v21 = vld [vmem:[%s1693_s3 + $0x88] sm:$0xff] }
 0x1cd   :  { %v1613_v22 = vpop.f32.mrf.mxu1 }
 0x1ce   :  { %v530_v17 = vadd.f32 %v1613_v22, %v386_v16  ;;  %v609_v19 = vmax.f32 %v535_v14, 0.0  ;;  %v993_v22 = vld [vmem:[%s1693_s3 + $0xf8] sm:$0xff] }
 0x1cf   :  { %v1615_v23 = vpop.f32.mrf.mxu1 }
 0x1d0   :  { %v545_v9 = vadd.f32 %v1615_v23, %v401_v4  ;;  %v608_v20 = vmax.f32 %v530_v17, 0.0  ;;  %v980_v23 = vld [vmem:[%s1693_s3 + $0x90] sm:$0xff] }
 0x1d1   :  { %v1617_v24 = vpop.f32.mrf.mxu1 }
 0x1d2   :  { %v540_v11 = vadd.f32 %v1617_v24, %v396_v8  ;;  %v611_v15 = vmax.f32 %v545_v9, 0.0  ;;  %v981_v24 = vld [vmem:[%s1693_s3 + $0x98] sm:$0xff] }
 0x1d3   :  { %v1619_v25 = vpop.f32.mrf.mxu1 }
 0x1d4   :  { %v555_v3 = vadd.f32 %v1619_v25, %v411_v61  ;;  %v610_v18 = vmax.f32 %v540_v11, 0.0  ;;  %v982_v25 = vld [vmem:[%s1693_s3 + $0xa0] sm:$0xff] }
 0x1d5   :  { %v1621_v26 = vpop.f32.mrf.mxu1 }
 0x1d6   :  { %v550_v5 = vadd.f32 %v1621_v26, %v406_v0  ;;  %v613_v10 = vmax.f32 %v555_v3, 0.0  ;;  %v983_v26 = vld [vmem:[%s1693_s3 + $0xa8] sm:$0xff] }
 0x1d7   :  { %v1164_v28 = vpop.f32.mrf.mxu1 }
 0x1d8   :  { %v565_v62 = vadd.f32 %v1164_v28, %v421_v53  ;;  %v612_v12 = vmax.f32 %v550_v5, 0.0  ;;  %v985_v28 = vld [vmem:[%s1693_s3 + $0xb8] sm:$0xff] }
 0x1d9   :  { %v559_v30 = vpop.f32.mrf.mxu1 }
 0x1da   :  { %v560_v1 = vadd.f32 %v559_v30, %v416_v56  ;;  %v615_v6 = vmax.f32 %v565_v62, 0.0  ;;  %v987_v30 = vld [vmem:[%s1693_s3 + $0xc8] sm:$0xff] }
 0x1db   :  { %v1167_v31 = vpop.f32.mrf.mxu1 }
 0x1dc   :  { %v575_v57 = vadd.f32 %v1167_v31, %v431_v43  ;;  %v614_v7 = vmax.f32 %v560_v1, 0.0  ;;  %v988_v31 = vld [vmem:[%s1693_s3 + $0xd0] sm:$0xff] }
 0x1dd   :  { %v569_v33 = vpop.f32.mrf.mxu1 }
 0x1de   :  { %v570_v59 = vadd.f32 %v569_v33, %v426_v48  ;;  %v617_v63 = vmax.f32 %v575_v57, 0.0  ;;  %v990_v33 = vld [vmem:[%s1693_s3 + $0xe0] sm:$0xff] }
 0x1df   :  { %v1170_v35 = vpop.f32.mrf.mxu1 }
 0x1e0   :  { %v585_v51 = vadd.f32 %v1170_v35, %v441_v37  ;;  %v616_v2 = vmax.f32 %v570_v59, 0.0  ;;  %v661_v35 = vpop.permute.xlu0 %660 }
 0x1e1   :  { %v579_v36 = vpop.f32.mrf.mxu1 }
 0x1e2   :  { %v580_v54 = vadd.f32 %v579_v36, %v436_v39  ;;  %v619_v58 = vmax.f32 %v585_v51, 0.0  ;;  %v666_v36 = vpop.permute.xlu1 %665 }
 0x1e3   :  { %v1173_v38 = vpop.f32.mrf.mxu1 }
 0x1e4   :  { %v595_v45 = vadd.f32 %v1173_v38, %v451_v32  ;;  %v618_v60 = vmax.f32 %v580_v54, 0.0  ;;  %v989_v32 = vld [vmem:[%s1693_s3 + $0xd8] sm:$0xff]  ;;  %v671_v37 = vpop.permute.xlu0 %670 }
 0x1e5   :  { %v589_v40 = vpop.f32.mrf.mxu1 }
 0x1e6   :  { %v590_v49 = vadd.f32 %v589_v40, %v446_v34  ;;  %v621_v52 = vmax.f32 %v595_v45, 0.0  ;;  %v991_v34 = vld [vmem:[%s1693_s3 + $0xe8] sm:$0xff]  ;;  %v676_v38 = vpop.permute.xlu1 %675 }
 0x1e7   :  { %v1176_v41 = vpop.f32.mrf.mxu1 }
 0x1e8   :  { %v605_v42 = vadd.f32 %v1176_v41, %v461_v27  ;;  %v620_v55 = vmax.f32 %v590_v49, 0.0  ;;  %v984_v27 = vld [vmem:[%s1693_s3 + $0xb0] sm:$0xff]  ;;  %v681_v39 = vpop.permute.xlu0 %680 }
 0x1e9   :  { %v599_v44 = vpop.f32.mrf.mxu1 }
 0x1ea   :  { %v623_v46 = vmax.f32 %v605_v42, 0.0  ;;  %v600_v47 = vadd.f32 %v599_v44, %v456_v29  ;;  %v986_v29 = vld [vmem:[%s1693_s3 + $0xc0] sm:$0xff]  ;;  %v686_v40 = vpop.permute.xlu1 %685  ;;  %s1296_s3 = smov [#allocation2]  }
 0x1eb   :  { %s952_s19 = sshll.u32 %s1296_s3, 4  ;;  %s953_s19 = int_to_ptr.vmem [resolvable:$true] %s952_s19 }
 0x1ec   :  { %v622_v50 = vmax.f32 %v600_v47, 0.0  ;;  %1177 = vmatprep.subr.mxu0 %v623_v46  ;;  %1233 = vmatprep.subr.mxu1 %v623_v46  ;;  %v691_v42 = vpop.permute.xlu0 %690  ;;  %s1273_s20 = scalar_lea.vmem %s953_s19, 16  ;;  %s1277_s21 = scalar_lea.vmem %s953_s19, 32 }
 0x1ed   :  { %1178 = vmatpush3.msra.mxu0 %v623_v46  ;;  %1249 = vmatpush3.msra.mxu1 %v623_v46  ;;  %p1274_p0 = scmp.ne.s32.totalorder %s953_s19, %s1273_s20  ;;  %p1278_p1 = scmp.lt.s32.totalorder %s953_s19, %s953_s19 }
 0x1ee   :  { %1179 = vmatprep.subr.mxu0 %v622_v50  ;;  %1234 = vmatprep.subr.mxu1 %v622_v50  ;;  %v696_v46 = vpop.permute.xlu1 %695  ;;  %p1279_p2 = scmp.lt.s32.totalorder %s1277_s21, %s1273_s20 }
 0x1ef   :  { %1180 = vmatpush3.msra.mxu0 %v622_v50  ;;  %1250 = vmatpush3.msra.mxu1 %v622_v50 }
 0x1f0   :  { %1181 = vmatprep.subr.mxu0 %v621_v52  ;;  %1235 = vmatprep.subr.mxu1 %v621_v52  ;;  %p1280_p3 = por %p1279_p2, %p1278_p1 }
 0x1f1   :  { %1182 = vmatpush3.msra.mxu0 %v621_v52  ;;  %1251 = vmatpush3.msra.mxu1 %v621_v52  ;;  %v701_v52 = vpop.permute.xlu0 %700 }
 0x1f2   :  { %1183 = vmatprep.subr.mxu0 %v620_v55  ;;  %1236 = vmatprep.subr.mxu1 %v620_v55  ;;  %p1281_p4 = pnand %p1280_p3, %p1274_p0 }
 0x1f3   :  { %1184 = vmatpush3.msra.mxu0 %v620_v55  ;;  %1252 = vmatpush3.msra.mxu1 %v620_v55 }
 0x1f4   :  { %1185 = vmatprep.subr.mxu0 %v619_v58  ;;  %1237 = vmatprep.subr.mxu1 %v619_v58 }
 0x1f5   :  { %1186 = vmatpush3.msra.mxu0 %v619_v58  ;;  %1253 = vmatpush3.msra.mxu1 %v619_v58  ;;  %v711_v3 = vpop.permute.xlu0 %710 }
 0x1f6   :  { %1187 = vmatprep.subr.mxu0 %v618_v60  ;;  %1238 = vmatprep.subr.mxu1 %v618_v60 }
 0x1f7   :  { %1188 = vmatpush3.msra.mxu0 %v618_v60  ;;  %1254 = vmatpush3.msra.mxu1 %v618_v60  ;;  %v706_v60 = vpop.permute.xlu1 %705 }
 0x1f8   :  { %1189 = vmatprep.subr.mxu0 %v617_v63  ;;  %1239 = vmatprep.subr.mxu1 %v617_v63 }
 0x1f9   :  { %1190 = vmatpush3.msra.mxu0 %v617_v63  ;;  %1255 = vmatpush3.msra.mxu1 %v617_v63 }
 0x1fa   :  { %1191 = vmatprep.subr.mxu0 %v616_v2  ;;  %1240 = vmatprep.subr.mxu1 %v616_v2 }
 0x1fb   :  { %1192 = vmatpush3.msra.mxu0 %v616_v2  ;;  %1256 = vmatpush3.msra.mxu1 %v616_v2 }
 0x1fc   :  { %1193 = vmatprep.subr.mxu0 %v615_v6  ;;  %1241 = vmatprep.subr.mxu1 %v615_v6 }
 0x1fd   :  { %1194 = vmatpush3.msra.mxu0 %v615_v6  ;;  %1257 = vmatpush3.msra.mxu1 %v615_v6 }
 0x1fe   :  { %1195 = vmatprep.subr.mxu0 %v614_v7  ;;  %1242 = vmatprep.subr.mxu1 %v614_v7 }
 0x1ff   :  { %1196 = vmatpush3.msra.mxu0 %v614_v7  ;;  %1258 = vmatpush3.msra.mxu1 %v614_v7 }
 0x200   :  { %1197 = vmatprep.subr.mxu0 %v613_v10  ;;  %1243 = vmatprep.subr.mxu1 %v613_v10 }
 0x201   :  { %1198 = vmatpush3.msra.mxu0 %v613_v10  ;;  %1259 = vmatpush3.msra.mxu1 %v613_v10 }
 0x202   :  { %1199 = vmatprep.subr.mxu0 %v612_v12  ;;  %1244 = vmatprep.subr.mxu1 %v612_v12 }
 0x203   :  { %1200 = vmatpush3.msra.mxu0 %v612_v12  ;;  %1260 = vmatpush3.msra.mxu1 %v612_v12  ;;  %v716_v12 = vpop.permute.xlu1 %715 }
 0x204   :  { %1201 = vmatprep.subr.mxu0 %v611_v15  ;;  %1245 = vmatprep.subr.mxu1 %v611_v15 }
 0x205   :  { %1202 = vmatpush3.msra.mxu0 %v611_v15  ;;  %1261 = vmatpush3.msra.mxu1 %v611_v15 }
 0x206   :  { %1203 = vmatprep.subr.mxu0 %v610_v18  ;;  %1246 = vmatprep.subr.mxu1 %v610_v18 }
 0x207   :  { %1204 = vmatpush3.msra.mxu0 %v610_v18  ;;  %1262 = vmatpush3.msra.mxu1 %v610_v18 }
 0x208   :  { %1205 = vmatprep.subr.mxu0 %v609_v19  ;;  %1247 = vmatprep.subr.mxu1 %v609_v19 }
 0x209   :  { %1206 = vmatpush3.msra.mxu0 %v609_v19  ;;  %1263 = vmatpush3.msra.mxu1 %v609_v19 }
 0x20a   :  { %1207 = vmatprep.subr.mxu0 %v608_v20  ;;  %1248 = vmatprep.subr.mxu1 %v608_v20 }
 0x20b   :  { %1208 = vmatpush3.msra.mxu0 %v608_v20  ;;  %1264 = vmatpush3.msra.mxu1 %v608_v20 }
 0x20c   :  { %1210 = vmatmul.mubr.f32.vlgmr.msra.gmra.mxu0 %v979_v21  ;;  %1231 = vmatmul.mubr.f32.vlgmr.msra.gmra.mxu1 %v993_v22  ;;  %v721_v21 = vpop.permute.xlu0 %720 }
 0x20d   :  { %1212 = vmatprep.mubr.f32.mxu0 %v980_v23 }
 0x210   :  { %1213 = vmatmul.mubr.f32.gmra.mxu0 %v981_v24 }
 0x211   :  { %1215 = vmatprep.mubr.f32.mxu0 %v982_v25 }
 0x214   :  { %1216 = vmatmul.mubr.f32.gmra.mxu0 %v983_v26 }
 0x215   :  { %1218 = vmatprep.mubr.f32.mxu0 %v984_v27 }
 0x218   :  { %1219 = vmatmul.mubr.f32.gmra.mxu0 %v985_v28 }
 0x219   :  { %1221 = vmatprep.mubr.f32.mxu0 %v986_v29 }
 0x21c   :  { %1222 = vmatmul.mubr.f32.gmra.mxu0 %v987_v30 }
 0x21d   :  { %1224 = vmatprep.mubr.f32.mxu0 %v988_v31  ;;  %v726_v31 = vpop.permute.xlu1 %725 }
 0x220   :  { %1225 = vmatmul.mubr.f32.gmra.mxu0 %v989_v32 }
 0x221   :  { %1227 = vmatprep.mubr.f32.mxu0 %v990_v33 }
 0x224   :  { %1228 = vmatmul.mubr.f32.gmra.mxu0 %v991_v34 }
 0x2cc   :  { %v1211_v41 = vpop.f32.mrf.mxu0  ;;  %v1232_v24 = vpop.f32.mrf.mxu1 }
 0x2cd   :  { %v810_v43 = vadd.f32 %v1211_v41, %v666_v36 }
 0x2ce   :  { %v804_v44 = vpop.f32.mrf.mxu0  ;;  %v874_v36 = vpop.f32.mrf.mxu1 }
 0x2cf   :  { %v805_v45 = vadd.f32 %v804_v44, %v661_v35  ;;  %v884_v48 = vmax.f32 %v810_v43, 0.0  ;;  %v731_v43 = vpop.permute.xlu0 %730 }
 0x2d0   :  { %v1214_v47 = vpop.f32.mrf.mxu0 }
 0x2d1   :  { %v883_v49 = vmax.f32 %v805_v45, 0.0  ;;  %v820_v50 = vadd.f32 %v1214_v47, %v676_v38  ;;  %v900_v56 = vsel %vm135_vm0, %v884_v48, 0.0 }
 0x2d2   :  { %v814_v51 = vpop.f32.mrf.mxu0 }
 0x2d3   :  { %v899_v53 = vsel %vm135_vm0, %v883_v49, 0.0  ;;  %v815_v54 = vadd.f32 %v814_v51, %v671_v37  ;;  %v886_v57 = vmax.f32 %v820_v50, 0.0  ;;  %v736_v49 = vpop.permute.xlu1 %735 }
 0x2d4   :  { %v1217_v55 = vpop.f32.mrf.mxu0  ;;  %v901_v61 = vadd.f32 %v900_v56, %v899_v53  ;;  %v880_v51 = vadd.f32 %v1232_v24, %v736_v49 }
 0x2d5   :  { %v885_v58 = vmax.f32 %v815_v54, 0.0  ;;  %v830_v59 = vadd.f32 %v1217_v55, %v686_v40  ;;  %v904_v6 = vsel %vm135_vm0, %v886_v57, 0.0 }
 0x2d6   :  { %v824_v62 = vpop.f32.mrf.mxu0 }
 0x2d7   :  { %v902_v63 = vsel %vm135_vm0, %v885_v58, 0.0  ;;  %v825_v0 = vadd.f32 %v824_v62, %v681_v39  ;;  %v888_v4 = vmax.f32 %v830_v59, 0.0  ;;  %v898_v59 = vmax.f32 %v880_v51, 0.0 }
 0x2d8   :  { %v903_v1 = vadd.f32 %v902_v63, %v901_v61  ;;  %v1220_v2 = vpop.f32.mrf.mxu0 }
 0x2d9   :  { %v887_v5 = vmax.f32 %v825_v0, 0.0  ;;  %v840_v7 = vadd.f32 %v1220_v2, %v696_v46  ;;  %v908_v15 = vsel %vm135_vm0, %v888_v4, 0.0  ;;  %v875_v46 = vadd.f32 %v874_v36, %v731_v43 }
 0x2da   :  { %v905_v8 = vadd.f32 %v904_v6, %v903_v1  ;;  %v834_v9 = vpop.f32.mrf.mxu0  ;;  %v928_v0 = vsel %vm135_vm0, %v898_v59, 0.0 }
 0x2db   :  { %v906_v10 = vsel %vm135_vm0, %v887_v5, 0.0  ;;  %v835_v11 = vadd.f32 %v834_v9, %v691_v42  ;;  %v890_v16 = vmax.f32 %v840_v7, 0.0  ;;  %v897_v56 = vmax.f32 %v875_v46, 0.0 }
 0x2dc   :  { %v907_v13 = vadd.f32 %v906_v10, %v905_v8  ;;  %v1223_v14 = vpop.f32.mrf.mxu0 }
 0x2dd   :  { %v889_v17 = vmax.f32 %v835_v11, 0.0  ;;  %v850_v18 = vadd.f32 %v1223_v14, %v706_v60  ;;  %v912_v27 = vsel %vm135_vm0, %v890_v16, 0.0  ;;  %v926_v62 = vsel %vm135_vm0, %v897_v56, 0.0 }
 0x2de   :  { %v909_v19 = vadd.f32 %v908_v15, %v907_v13  ;;  %v844_v20 = vpop.f32.mrf.mxu0 }
 0x2df   :  { %v910_v22 = vsel %vm135_vm0, %v889_v17, 0.0  ;;  %v845_v23 = vadd.f32 %v844_v20, %v701_v52  ;;  %v892_v28 = vmax.f32 %v850_v18, 0.0 }
 0x2e0   :  { %v911_v25 = vadd.f32 %v910_v22, %v909_v19  ;;  %v1226_v26 = vpop.f32.mrf.mxu0 }
 0x2e1   :  { %v891_v29 = vmax.f32 %v845_v23, 0.0  ;;  %v860_v30 = vadd.f32 %v1226_v26, %v716_v12  ;;  %v916_v39 = vsel %vm135_vm0, %v892_v28, 0.0 }
 0x2e2   :  { %v913_v32 = vadd.f32 %v912_v27, %v911_v25  ;;  %v854_v33 = vpop.f32.mrf.mxu0 }
 0x2e3   :  { %v914_v34 = vsel %vm135_vm0, %v891_v29, 0.0  ;;  %v855_v35 = vadd.f32 %v854_v33, %v711_v3  ;;  %v894_v40 = vmax.f32 %v860_v30, 0.0 }
 0x2e4   :  { %v915_v37 = vadd.f32 %v914_v34, %v913_v32  ;;  %v1229_v38 = vpop.f32.mrf.mxu0 }
 0x2e5   :  { %v893_v41 = vmax.f32 %v855_v35, 0.0  ;;  %v870_v42 = vadd.f32 %v1229_v38, %v726_v31  ;;  %v920_v52 = vsel %vm135_vm0, %v894_v40, 0.0 }
 0x2e6   :  { %v917_v44 = vadd.f32 %v916_v39, %v915_v37  ;;  %v864_v45 = vpop.f32.mrf.mxu0 }
 0x2e7   :  { %v918_v47 = vsel %vm135_vm0, %v893_v41, 0.0  ;;  %v865_v48 = vadd.f32 %v864_v45, %v721_v21  ;;  %v896_v53 = vmax.f32 %v870_v42, 0.0 }
 0x2e8   :  { %v919_v50 = vadd.f32 %v918_v47, %v917_v44 }
 0x2e9   :  { %v895_v54 = vmax.f32 %v865_v48, 0.0  ;;  %v924_v60 = vsel %vm135_vm0, %v896_v53, 0.0 }
 0x2ea   :  { %v921_v55 = vadd.f32 %v920_v52, %v919_v50 }
 0x2eb   :  { %v922_v57 = vsel %vm135_vm0, %v895_v54, 0.0 }
 0x2ec   :  { %v923_v58 = vadd.f32 %v922_v57, %v921_v55 }
 0x2ee   :  { %v925_v61 = vadd.f32 %v924_v60, %v923_v58 }
 0x2f0   :  { %v927_v63 = vadd.f32 %v926_v62, %v925_v61 }
 0x2f2   :  { %v929_v1 = vadd.f32 %v928_v0, %v927_v63 }
 0x2f4   :  { %v930_v2 = vrot.slane %v929_v1, 4 }
 0x2f6   :  { %v931_v3 = vadd.f32 %v930_v2, %v929_v1 }
 0x2f8   :  { %v932_v6 = vrot.slane %v931_v3, 2 }
 0x2fa   :  { %v933_v4 = vadd.f32 %v932_v6, %v931_v3 }
 0x2fc   :  { %v934_v5 = vrot.slane %v933_v4, 1 }
 0x2fe   :  { %v935_v7 = vadd.f32 %v934_v5, %v933_v4 }
 0x300   :  { %v936_v8 = vmul.f32 0.5, %v935_v7 }
 0x302   :  { %v937_v9 = vadd.f32 0.5, %v936_v8 }
 0x304   :  { %v1010_v10 = vmul.f32 -1.442695, %v937_v9 }
 0x306   :  { %1269 = vpow2.f32 %v1010_v10 }
 0x313   :  { %v1270_v11 = vpop.eup %1269 }
 0x314   :  { %v941_v12 = vadd.f32 1.0, %v1270_v11 }
 0x316   :  { %1271 = vrcp.f32 %v941_v12 }
 0x323   :  { %v1272_v13 = vpop.eup %1271 }
 0x324   :  { %945 = vst.msk [vmem:[#allocation2] sm:$0x1] %vm944_vm1, %v1272_v13 }
 0x325   :  { %1284 = shalt.err (!%p1281_p4)
}
 0x326   :  { %955 = dma.vmem_to_hbm [thread:$0]  %s953_s19, 16, %s1695_s5, [#allocation3]  }
 0x327   :  { %1293 = dma.done.wait [#allocation3], 16  }
 0x328   :  { %1294 = vsyncadd [#allocation3], 4294967280 }
 0x329   :  { %959 = vsyncpa [#allocation3], 1 }

// kernel: tpu_custom_call.1
= control target key start
LH: loop header
LB: loop body
LE: loop exit
PB: predicated region body
PF: predicated region fallthrough
CT: control target
= control target key end

     0   :  { %vm135_vm0 = vcmask 130048   ;;  %v1295_v4 = vmov 0   ;;  %s1690_s0 = inlined_call_operand.vmem [shape: f32[16,16], index: 0, kind: input, shape index: {}]   ;;  %s1691_s1 = inlined_call_operand.vmem [shape: f32[128,16], index: 1, kind: input, shape index: {}]   ;;  %s1692_s2 = inlined_call_operand.vmem [shape: f32[128,1], index: 2, kind: input, shape index: {}]   ;;  %s1693_s3 = inlined_call_operand.vmem [shape: f32[2,128,128], index: 3, kind: input, shape index: {}]   ;;  %s1694_s4 = inlined_call_operand.vmem [shape: f32[2,128,1], index: 4, kind: input, shape index: {}]   ;;  %s1695_s5 = inlined_call_operand.hbm [shape: f32[1,16], index: 5, kind: output, shape index: {}]  }
   0x1   :  { %v22_v0 = vld [vmem:[%s1690_s0 + $0x8] sm:$0xff]  ;;  %v21_v1 = vld [vmem:[%s1690_s0] sm:$0xff]  ;;  %v54_v3 = vld [vmem:[%s1692_s2 + $0x78] sm:$0xff]  ;;  %1267 = vset.pattern.permute.xlu0 %v1295_v4  ;;  %1268 = vset.pattern.permute.xlu1 %v1295_v4 }
   0x2   :  { %v23_v2 = vld [vmem:[%s1691_s1] sm:$0xff]  ;;  %1093 = vmatprep.subr.msk.mxu0 %vm135_vm0, %v22_v0  ;;  %v52_v5 = vld [vmem:[%s1692_s2 + $0x68] sm:$0xff]  ;;  %132 = vperm.xlu0 %1267, %v54_v3   ;;  %v53_v6 = vld [vmem:[%s1692_s2 + $0x70] sm:$0xff] }
   0x3   :  { %1097 = vmatprep.mubr.msk.f32.mxu0 %vm135_vm0, %v23_v2  ;;  %1094 = vmatpush3.xpose.msk.msra.mxu0 %vm135_vm0, %v22_v0  ;;  %v24_v7 = vld [vmem:[%s1691_s1 + $0x8] sm:$0xff]  ;;  %v51_v8 = vld [vmem:[%s1692_s2 + $0x60] sm:$0xff]  ;;  %v25_v9 = vld [vmem:[%s1691_s1 + $0x10] sm:$0xff] }
   0x4   :  { %1095 = vmatprep.subr.msk.mxu0 %vm135_vm0, %v21_v1  ;;  %122 = vperm.xlu1 %1268, %v52_v5   ;;  %v50_v10 = vld [vmem:[%s1692_s2 + $0x58] sm:$0xff]  ;;  %v49_v12 = vld [vmem:[%s1692_s2 + $0x50] sm:$0xff]  ;;  %v27_v13 = vld [vmem:[%s1691_s1 + $0x20] sm:$0xff] }
   0x5   :  { %v26_v11 = vld [vmem:[%s1691_s1 + $0x18] sm:$0xff]  ;;  %v48_v14 = vld [vmem:[%s1692_s2 + $0x48] sm:$0xff]  ;;  %v47_v16 = vld [vmem:[%s1692_s2 + $0x40] sm:$0xff] }
   0x6   :  { %127 = vperm.xlu0 %1267, %v53_v6   ;;  %v28_v15 = vld [vmem:[%s1691_s1 + $0x28] sm:$0xff]  ;;  %v29_v17 = vld [vmem:[%s1691_s1 + $0x30] sm:$0xff]  ;;  %v46_v18 = vld [vmem:[%s1692_s2 + $0x38] sm:$0xff] }
   0x7   :  { %1096 = vmatpush3.xpose.msk.msra.mxu0 %vm135_vm0, %v21_v1  ;;  %v30_v19 = vld [vmem:[%s1691_s1 + $0x38] sm:$0xff]  ;;  %v45_v20 = vld [vmem:[%s1692_s2 + $0x30] sm:$0xff]  ;;  %v31_v21 = vld [vmem:[%s1691_s1 + $0x40] sm:$0xff] }
   0x8   :  { %117 = vperm.xlu1 %1268, %v51_v8   ;;  %v44_v22 = vld [vmem:[%s1692_s2 + $0x28] sm:$0xff]  ;;  %v43_v24 = vld [vmem:[%s1692_s2 + $0x20] sm:$0xff] }
   0x9   :  { %v32_v23 = vld [vmem:[%s1691_s1 + $0x48] sm:$0xff] }
   0xa   :  { %1098 = vmatmul.mubr.msk.f32.vlgmr.msra.gmra.mxu0 %vm135_vm0, %v24_v7  ;;  %112 = vperm.xlu0 %1267, %v50_v10  }
   0xb   :  { %1100 = vmatprep.mubr.msk.f32.mxu0 %vm135_vm0, %v25_v9 }
   0xc   :  { %107 = vperm.xlu1 %1268, %v49_v12  }
   0xe   :  { %1101 = vmatmul.mubr.msk.f32.gmra.mxu0 %vm135_vm0, %v26_v11  ;;  %102 = vperm.xlu0 %1267, %v48_v14  }
   0xf   :  { %1103 = vmatprep.mubr.msk.f32.mxu0 %vm135_vm0, %v27_v13 }
  0x10   :  { %97 = vperm.xlu1 %1268, %v47_v16  }
  0x12   :  { %1104 = vmatmul.mubr.msk.f32.gmra.mxu0 %vm135_vm0, %v28_v15  ;;  %92 = vperm.xlu0 %1267, %v46_v18  }
  0x13   :  { %1106 = vmatprep.mubr.msk.f32.mxu0 %vm135_vm0, %v29_v17 }
  0x14   :  { %87 = vperm.xlu1 %1268, %v45_v20  }
  0x16   :  { %1107 = vmatmul.mubr.msk.f32.gmra.mxu0 %vm135_vm0, %v30_v19 }
  0x17   :  { %1109 = vmatprep.mubr.msk.f32.mxu0 %vm135_vm0, %v31_v21 }
  0x18   :  { %10 = vsyncpa [#allocation3], 0  ;;  %v33_v25 = vld [vmem:[%s1691_s1 + $0x50] sm:$0xff]  ;;  %82 = vperm.xlu0 %1267, %v44_v22   ;;  %v42_v26 = vld [vmem:[%s1692_s2 + $0x18] sm:$0xff]  ;;  %77 = vperm.xlu1 %1268, %v43_v24   ;;  %vm944_vm1 = vcmask 122880  }
  0x19   :  { %v34_v27 = vld [vmem:[%s1691_s1 + $0x58] sm:$0xff]  ;;  %v41_v28 = vld [vmem:[%s1692_s2 + $0x10] sm:$0xff]  ;;  %v35_v29 = vld [vmem:[%s1691_s1 + $0x60] sm:$0xff] }
  0x1a   :  { %1110 = vmatmul.mubr.msk.f32.gmra.mxu0 %vm135_vm0, %v32_v23  ;;  %v40_v30 = vld [vmem:[%s1692_s2 + $0x8] sm:$0xff]  ;;  %v39_v32 = vld [vmem:[%s1692_s2] sm:$0xff]  ;;  %v37_v33 = vld [vmem:[%s1691_s1 + $0x70] sm:$0xff] }
  0x1b   :  { %1112 = vmatprep.mubr.msk.f32.mxu0 %vm135_vm0, %v33_v25  ;;  %v36_v31 = vld [vmem:[%s1691_s1 + $0x68] sm:$0xff]  ;;  %v382_v34 = vld [vmem:[%s1694_s4 + $0x78] sm:$0xff]  ;;  %v381_v36 = vld [vmem:[%s1694_s4 + $0x70] sm:$0xff] }
  0x1c   :  { %72 = vperm.xlu0 %1267, %v42_v26   ;;  %67 = vperm.xlu1 %1268, %v41_v28   ;;  %v38_v35 = vld [vmem:[%s1691_s1 + $0x78] sm:$0xff]  ;;  %v380_v37 = vld [vmem:[%s1694_s4 + $0x68] sm:$0xff]  ;;  %v379_v38 = vld [vmem:[%s1694_s4 + $0x60] sm:$0xff] }
  0x1d   :  { %v378_v39 = vld [vmem:[%s1694_s4 + $0x58] sm:$0xff]  ;;  %v377_v40 = vld [vmem:[%s1694_s4 + $0x50] sm:$0xff]  ;;  %v376_v41 = vld [vmem:[%s1694_s4 + $0x48] sm:$0xff] }
  0x1e   :  { %1113 = vmatmul.mubr.msk.f32.gmra.mxu0 %vm135_vm0, %v34_v27  ;;  %v375_v42 = vld [vmem:[%s1694_s4 + $0x40] sm:$0xff]  ;;  %v374_v43 = vld [vmem:[%s1694_s4 + $0x38] sm:$0xff]  ;;  %v373_v44 = vld [vmem:[%s1694_s4 + $0x30] sm:$0xff] }
  0x1f   :  { %1115 = vmatprep.mubr.msk.f32.mxu0 %vm135_vm0, %v35_v29  ;;  %v372_v45 = vld [vmem:[%s1694_s4 + $0x28] sm:$0xff]  ;;  %v371_v46 = vld [vmem:[%s1694_s4 + $0x20] sm:$0xff]  ;;  %v370_v47 = vld [vmem:[%s1694_s4 + $0x18] sm:$0xff] }
  0x20   :  { %62 = vperm.xlu0 %1267, %v40_v30   ;;  %57 = vperm.xlu1 %1268, %v39_v32   ;;  %v369_v48 = vld [vmem:[%s1694_s4 + $0x10] sm:$0xff]  ;;  %v368_v49 = vld [vmem:[%s1694_s4 + $0x8] sm:$0xff]  ;;  %v367_v50 = vld [vmem:[%s1694_s4] sm:$0xff] }
  0x21   :  { %v994_v51 = vld [vmem:[%s1694_s4 + $0x80] sm:$0xff]  ;;  %v995_v52 = vld [vmem:[%s1694_s4 + $0x88] sm:$0xff]  ;;  %v996_v53 = vld [vmem:[%s1694_s4 + $0x90] sm:$0xff] }
  0x22   :  { %1116 = vmatmul.mubr.msk.f32.gmra.mxu0 %vm135_vm0, %v36_v31  ;;  %v997_v54 = vld [vmem:[%s1694_s4 + $0x98] sm:$0xff]  ;;  %v998_v55 = vld [vmem:[%s1694_s4 + $0xa0] sm:$0xff]  ;;  %v999_v56 = vld [vmem:[%s1694_s4 + $0xa8] sm:$0xff] }
  0x23   :  { %1118 = vmatprep.mubr.msk.f32.mxu0 %vm135_vm0, %v37_v33  ;;  %v1000_v57 = vld [vmem:[%s1694_s4 + $0xb0] sm:$0xff]  ;;  %v1001_v58 = vld [vmem:[%s1694_s4 + $0xb8] sm:$0xff]  ;;  %v1002_v59 = vld [vmem:[%s1694_s4 + $0xc0] sm:$0xff] }
  0x24   :  { %460 = vperm.xlu0 %1267, %v382_v34   ;;  %455 = vperm.xlu1 %1268, %v381_v36   ;;  %v1003_v60 = vld [vmem:[%s1694_s4 + $0xc8] sm:$0xff]  ;;  %v1004_v61 = vld [vmem:[%s1694_s4 + $0xd0] sm:$0xff]  ;;  %v1005_v62 = vld [vmem:[%s1694_s4 + $0xd8] sm:$0xff] }
  0x25   :  { %v1006_v63 = vld [vmem:[%s1694_s4 + $0xe0] sm:$0xff]  ;;  %v1007_v0 = vld [vmem:[%s1694_s4 + $0xe8] sm:$0xff]  ;;  %v1008_v1 = vld [vmem:[%s1694_s4 + $0xf0] sm:$0xff] }
  0x26   :  { %1119 = vmatmul.mubr.msk.f32.gmra.mxu0 %vm135_vm0, %v38_v35  ;;  %v1009_v2 = vld [vmem:[%s1694_s4 + $0xf8] sm:$0xff]  ;;  %v351_v3 = vld [vmem:[%s1693_s3] sm:$0xff] }
  0x27   :  { %1153 = vmatprep.mubr.f32.mxu1 %v351_v3 }
  0x28   :  { %450 = vperm.xlu0 %1267, %v380_v37   ;;  %445 = vperm.xlu1 %1268, %v379_v38  }
  0x2c   :  { %440 = vperm.xlu0 %1267, %v378_v39   ;;  %435 = vperm.xlu1 %1268, %v377_v40  }
  0x30   :  { %430 = vperm.xlu0 %1267, %v376_v41   ;;  %425 = vperm.xlu1 %1268, %v375_v42  }
  0x34   :  { %420 = vperm.xlu0 %1267, %v374_v43   ;;  %415 = vperm.xlu1 %1268, %v373_v44  }
  0x38   :  { %410 = vperm.xlu0 %1267, %v372_v45   ;;  %405 = vperm.xlu1 %1268, %v371_v46  }
  0x3c   :  { %400 = vperm.xlu0 %1267, %v370_v47   ;;  %395 = vperm.xlu1 %1268, %v369_v48  }
  0x40   :  { %390 = vperm.xlu0 %1267, %v368_v49   ;;  %385 = vperm.xlu1 %1268, %v367_v50  }
  0x44   :  { %660 = vperm.xlu0 %1267, %v994_v51   ;;  %665 = vperm.xlu1 %1268, %v995_v52  }
  0x48   :  { %670 = vperm.xlu0 %1267, %v996_v53   ;;  %675 = vperm.xlu1 %1268, %v997_v54  }
  0x4c   :  { %680 = vperm.xlu0 %1267, %v998_v55   ;;  %685 = vperm.xlu1 %1268, %v999_v56  }
  0x50   :  { %690 = vperm.xlu0 %1267, %v1000_v57   ;;  %695 = vperm.xlu1 %1268, %v1001_v58  }
  0x54   :  { %700 = vperm.xlu0 %1267, %v1002_v59   ;;  %705 = vperm.xlu1 %1268, %v1003_v60  }
  0x58   :  { %710 = vperm.xlu0 %1267, %v1004_v61   ;;  %715 = vperm.xlu1 %1268, %v1005_v62  }
  0x5c   :  { %720 = vperm.xlu0 %1267, %v1006_v63   ;;  %725 = vperm.xlu1 %1268, %v1007_v0  }
  0x60   :  { %730 = vperm.xlu0 %1267, %v1008_v1   ;;  %735 = vperm.xlu1 %1268, %v1009_v2  }
  0x7d   :  { %v133_v10 = vpop.permute.xlu0 %132 }
  0x7f   :  { %v123_v12 = vpop.permute.xlu1 %122 }
  0x81   :  { %v128_v15 = vpop.permute.xlu0 %127 }
  0x83   :  { %v118_v17 = vpop.permute.xlu1 %117 }
  0x85   :  { %v113_v20 = vpop.permute.xlu0 %112 }
  0x87   :  { %v108_v22 = vpop.permute.xlu1 %107 }
  0x89   :  { %v103_v26 = vpop.permute.xlu0 %102 }
  0x8b   :  { %v98_v31 = vpop.permute.xlu1 %97 }
  0x8d   :  { %v93_v36 = vpop.permute.xlu0 %92 }
  0x8f   :  { %v88_v39 = vpop.permute.xlu1 %87 }
  0x93   :  { %v83_v44 = vpop.permute.xlu0 %82  ;;  %v78_v47 = vpop.permute.xlu1 %77 }
  0x97   :  { %v73_v52 = vpop.permute.xlu0 %72  ;;  %v68_v55 = vpop.permute.xlu1 %67 }
  0x9b   :  { %v63_v60 = vpop.permute.xlu0 %62  ;;  %v58_v63 = vpop.permute.xlu1 %57 }
  0xca   :  { %v1548_v4 = vpop.f32.mrf.mxu0 }
  0xcb   :  { %v262_v61 = vadd.f32 %v1548_v4, %v63_v60  ;;  %v353_v4 = vld [vmem:[%s1693_s3 + $0x10] sm:$0xff] }
  0xcc   :  { %v1550_v5 = vpop.f32.mrf.mxu0 }
  0xcd   :  { %v257_v0 = vadd.f32 %v1550_v5, %v58_v63  ;;  %v336_v2 = vmax.f32 %v262_v61, 0.0  ;;  %v354_v5 = vld [vmem:[%s1693_s3 + $0x18] sm:$0xff] }
  0xce   :  { %v1552_v6 = vpop.f32.mrf.mxu0 }
  0xcf   :  { %v272_v56 = vadd.f32 %v1552_v6, %v73_v52  ;;  %v335_v3 = vmax.f32 %v257_v0, 0.0  ;;  %v352_v6 = vld [vmem:[%s1693_s3 + $0x8] sm:$0xff] }
  0xd0   :  { %v1554_v7 = vpop.f32.mrf.mxu0 }
  0xd1   :  { %v267_v58 = vadd.f32 %v1554_v7, %v68_v55  ;;  %v338_v62 = vmax.f32 %v272_v56, 0.0  ;;  %v355_v7 = vld [vmem:[%s1693_s3 + $0x20] sm:$0xff] }
  0xd2   :  { %v1105_v8 = vpop.f32.mrf.mxu0 }
  0xd3   :  { %v282_v50 = vadd.f32 %v1105_v8, %v83_v44  ;;  %v337_v1 = vmax.f32 %v267_v58, 0.0  ;;  %v356_v8 = vld [vmem:[%s1693_s3 + $0x28] sm:$0xff] }
  0xd4   :  { %v276_v9 = vpop.f32.mrf.mxu0 }
  0xd5   :  { %v277_v53 = vadd.f32 %v276_v9, %v78_v47  ;;  %v340_v57 = vmax.f32 %v282_v50, 0.0  ;;  %v357_v9 = vld [vmem:[%s1693_s3 + $0x30] sm:$0xff] }
  0xd6   :  { %v1108_v11 = vpop.f32.mrf.mxu0 }
  0xd7   :  { %v292_v45 = vadd.f32 %v1108_v11, %v93_v36  ;;  %v339_v59 = vmax.f32 %v277_v53, 0.0  ;;  %v359_v11 = vld [vmem:[%s1693_s3 + $0x40] sm:$0xff] }
  0xd8   :  { %v286_v13 = vpop.f32.mrf.mxu0 }
  0xd9   :  { %v287_v48 = vadd.f32 %v286_v13, %v88_v39  ;;  %v342_v51 = vmax.f32 %v292_v45, 0.0  ;;  %v361_v13 = vld [vmem:[%s1693_s3 + $0x50] sm:$0xff] }
  0xda   :  { %v1111_v14 = vpop.f32.mrf.mxu0 }
  0xdb   :  { %v302_v40 = vadd.f32 %v1111_v14, %v103_v26  ;;  %v341_v54 = vmax.f32 %v287_v48, 0.0  ;;  %v362_v14 = vld [vmem:[%s1693_s3 + $0x58] sm:$0xff] }
  0xdc   :  { %v296_v16 = vpop.f32.mrf.mxu0 }
  0xdd   :  { %v297_v42 = vadd.f32 %v296_v16, %v98_v31  ;;  %v344_v46 = vmax.f32 %v302_v40, 0.0  ;;  %v364_v16 = vld [vmem:[%s1693_s3 + $0x68] sm:$0xff] }
  0xde   :  { %v1114_v18 = vpop.f32.mrf.mxu0 }
  0xdf   :  { %v312_v34 = vadd.f32 %v1114_v18, %v113_v20  ;;  %v343_v49 = vmax.f32 %v297_v42, 0.0  ;;  %v366_v18 = vld [vmem:[%s1693_s3 + $0x78] sm:$0xff]  ;;  %v992_v20 = vld [vmem:[%s1693_s3 + $0xf0] sm:$0xff] }
  0xe0   :  { %v306_v19 = vpop.f32.mrf.mxu0 }
  0xe1   :  { %v307_v37 = vadd.f32 %v306_v19, %v108_v22  ;;  %v346_v41 = vmax.f32 %v312_v34, 0.0  ;;  %v978_v19 = vld [vmem:[%s1693_s3 + $0x80] sm:$0xff] }
  0xe2   :  { %v1117_v21 = vpop.f32.mrf.mxu0  ;;  %1209 = vmatprep.mubr.f32.mxu0 %v978_v19 }
  0xe3   :  { %v322_v28 = vadd.f32 %v1117_v21, %v123_v12  ;;  %v345_v43 = vmax.f32 %v307_v37, 0.0  ;;  %v360_v12 = vld [vmem:[%s1693_s3 + $0x48] sm:$0xff] }
  0xe4   :  { %v316_v23 = vpop.f32.mrf.mxu0 }
  0xe5   :  { %v317_v32 = vadd.f32 %v316_v23, %v118_v17  ;;  %v348_v35 = vmax.f32 %v322_v28, 0.0  ;;  %v365_v17 = vld [vmem:[%s1693_s3 + $0x70] sm:$0xff] }
  0xe6   :  { %v1120_v24 = vpop.f32.mrf.mxu0 }
  0xe7   :  { %v332_v25 = vadd.f32 %v1120_v24, %v133_v10  ;;  %v347_v38 = vmax.f32 %v317_v32, 0.0  ;;  %v358_v10 = vld [vmem:[%s1693_s3 + $0x38] sm:$0xff] }
  0xe8   :  { %v326_v27 = vpop.f32.mrf.mxu0 }
  0xe9   :  { %v350_v29 = vmax.f32 %v332_v25, 0.0  ;;  %v327_v30 = vadd.f32 %v326_v27, %v128_v15  ;;  %v363_v15 = vld [vmem:[%s1693_s3 + $0x60] sm:$0xff]  ;;  %v461_v27 = vpop.permute.xlu0 %460 }
  0xeb   :  { %v349_v33 = vmax.f32 %v327_v30, 0.0  ;;  %1121 = vmatprep.subr.mxu1 %v350_v29 }
  0xec   :  { %1122 = vmatpush3.msra.mxu1 %v350_v29  ;;  %v456_v29 = vpop.permute.xlu1 %455 }
  0xed   :  { %1123 = vmatprep.subr.mxu1 %v349_v33  ;;  %v451_v32 = vpop.permute.xlu0 %450 }
  0xee   :  { %1124 = vmatpush3.msra.mxu1 %v349_v33 }
  0xef   :  { %1125 = vmatprep.subr.mxu1 %v348_v35 }
  0xf0   :  { %1126 = vmatpush3.msra.mxu1 %v348_v35  ;;  %v446_v34 = vpop.permute.xlu1 %445 }
  0xf1   :  { %1127 = vmatprep.subr.mxu1 %v347_v38  ;;  %v441_v37 = vpop.permute.xlu0 %440 }
  0xf2   :  { %1128 = vmatpush3.msra.mxu1 %v347_v38 }
  0xf3   :  { %1129 = vmatprep.subr.mxu1 %v346_v41 }
  0xf4   :  { %1130 = vmatpush3.msra.mxu1 %v346_v41  ;;  %v436_v39 = vpop.permute.xlu1 %435 }
  0xf5   :  { %1131 = vmatprep.subr.mxu1 %v345_v43 }
  0xf6   :  { %1132 = vmatpush3.msra.mxu1 %v345_v43  ;;  %v431_v43 = vpop.permute.xlu0 %430 }
  0xf7   :  { %1133 = vmatprep.subr.mxu1 %v344_v46 }
  0xf8   :  { %1134 = vmatpush3.msra.mxu1 %v344_v46  ;;  %v426_v48 = vpop.permute.xlu1 %425 }
  0xf9   :  { %1135 = vmatprep.subr.mxu1 %v343_v49 }
  0xfa   :  { %1136 = vmatpush3.msra.mxu1 %v343_v49  ;;  %v421_v53 = vpop.permute.xlu0 %420 }
  0xfb   :  { %1137 = vmatprep.subr.mxu1 %v342_v51 }
  0xfc   :  { %1138 = vmatpush3.msra.mxu1 %v342_v51  ;;  %v416_v56 = vpop.permute.xlu1 %415 }
  0xfd   :  { %1139 = vmatprep.subr.mxu1 %v341_v54 }
  0xfe   :  { %1140 = vmatpush3.msra.mxu1 %v341_v54  ;;  %v411_v61 = vpop.permute.xlu0 %410 }
  0xff   :  { %1141 = vmatprep.subr.mxu1 %v340_v57 }
 0x100   :  { %1142 = vmatpush3.msra.mxu1 %v340_v57  ;;  %v406_v0 = vpop.permute.xlu1 %405 }
 0x101   :  { %1143 = vmatprep.subr.mxu1 %v339_v59 }
 0x102   :  { %1144 = vmatpush3.msra.mxu1 %v339_v59 }
 0x103   :  { %1145 = vmatprep.subr.mxu1 %v338_v62 }
 0x104   :  { %1146 = vmatpush3.msra.mxu1 %v338_v62 }
 0x105   :  { %1147 = vmatprep.subr.mxu1 %v337_v1 }
 0x106   :  { %1148 = vmatpush3.msra.mxu1 %v337_v1 }
 0x107   :  { %1149 = vmatprep.subr.mxu1 %v336_v2 }
 0x108   :  { %1150 = vmatpush3.msra.mxu1 %v336_v2 }
 0x109   :  { %1151 = vmatprep.subr.mxu1 %v335_v3 }
 0x10a   :  { %1152 = vmatpush3.msra.mxu1 %v335_v3 }
 0x10b   :  { %1154 = vmatmul.mubr.f32.vlgmr.msra.gmra.mxu1 %v352_v6 }
 0x10c   :  { %1156 = vmatprep.mubr.f32.mxu1 %v353_v4  ;;  %v401_v4 = vpop.permute.xlu0 %400 }
 0x10f   :  { %1157 = vmatmul.mubr.f32.gmra.mxu1 %v354_v5 }
 0x110   :  { %1159 = vmatprep.mubr.f32.mxu1 %v355_v7 }
 0x113   :  { %1160 = vmatmul.mubr.f32.gmra.mxu1 %v356_v8  ;;  %v396_v8 = vpop.permute.xlu1 %395 }
 0x114   :  { %1162 = vmatprep.mubr.f32.mxu1 %v357_v9 }
 0x117   :  { %1163 = vmatmul.mubr.f32.gmra.mxu1 %v358_v10 }
 0x118   :  { %1165 = vmatprep.mubr.f32.mxu1 %v359_v11 }
 0x11b   :  { %1166 = vmatmul.mubr.f32.gmra.mxu1 %v360_v12 }
 0x11c   :  { %1168 = vmatprep.mubr.f32.mxu1 %v361_v13  ;;  %v391_v13 = vpop.permute.xlu0 %390 }
 0x11f   :  { %1169 = vmatmul.mubr.f32.gmra.mxu1 %v362_v14 }
 0x120   :  { %1171 = vmatprep.mubr.f32.mxu1 %v363_v15 }
 0x123   :  { %1172 = vmatmul.mubr.f32.gmra.mxu1 %v364_v16  ;;  %v386_v16 = vpop.permute.xlu1 %385 }
 0x124   :  { %1174 = vmatprep.mubr.f32.mxu1 %v365_v17 }
 0x127   :  { %1175 = vmatmul.mubr.f32.gmra.mxu1 %v366_v18 }
 0x128   :  { %1230 = vmatprep.mubr.f32.mxu1 %v992_v20 }
 0x1cb   :  { %v1611_v21 = vpop.f32.mrf.mxu1 }
 0x1cc   :  { %v535_v14 = vadd.f32 %v1611_v21, %v391_v13  ;;  %v979_v21 = vld [vmem:[%s1693_s3 + $0x88] sm:$0xff] }
 0x1cd   :  { %v1613_v22 = vpop.f32.mrf.mxu1 }
 0x1ce   :  { %v530_v17 = vadd.f32 %v1613_v22, %v386_v16  ;;  %v609_v19 = vmax.f32 %v535_v14, 0.0  ;;  %v993_v22 = vld [vmem:[%s1693_s3 + $0xf8] sm:$0xff] }
 0x1cf   :  { %v1615_v23 = vpop.f32.mrf.mxu1 }
 0x1d0   :  { %v545_v9 = vadd.f32 %v1615_v23, %v401_v4  ;;  %v608_v20 = vmax.f32 %v530_v17, 0.0  ;;  %v980_v23 = vld [vmem:[%s1693_s3 + $0x90] sm:$0xff] }
 0x1d1   :  { %v1617_v24 = vpop.f32.mrf.mxu1 }
 0x1d2   :  { %v540_v11 = vadd.f32 %v1617_v24, %v396_v8  ;;  %v611_v15 = vmax.f32 %v545_v9, 0.0  ;;  %v981_v24 = vld [vmem:[%s1693_s3 + $0x98] sm:$0xff] }
 0x1d3   :  { %v1619_v25 = vpop.f32.mrf.mxu1 }
 0x1d4   :  { %v555_v3 = vadd.f32 %v1619_v25, %v411_v61  ;;  %v610_v18 = vmax.f32 %v540_v11, 0.0  ;;  %v982_v25 = vld [vmem:[%s1693_s3 + $0xa0] sm:$0xff] }
 0x1d5   :  { %v1621_v26 = vpop.f32.mrf.mxu1 }
 0x1d6   :  { %v550_v5 = vadd.f32 %v1621_v26, %v406_v0  ;;  %v613_v10 = vmax.f32 %v555_v3, 0.0  ;;  %v983_v26 = vld [vmem:[%s1693_s3 + $0xa8] sm:$0xff] }
 0x1d7   :  { %v1164_v28 = vpop.f32.mrf.mxu1 }
 0x1d8   :  { %v565_v62 = vadd.f32 %v1164_v28, %v421_v53  ;;  %v612_v12 = vmax.f32 %v550_v5, 0.0  ;;  %v985_v28 = vld [vmem:[%s1693_s3 + $0xb8] sm:$0xff] }
 0x1d9   :  { %v559_v30 = vpop.f32.mrf.mxu1 }
 0x1da   :  { %v560_v1 = vadd.f32 %v559_v30, %v416_v56  ;;  %v615_v6 = vmax.f32 %v565_v62, 0.0  ;;  %v987_v30 = vld [vmem:[%s1693_s3 + $0xc8] sm:$0xff] }
 0x1db   :  { %v1167_v31 = vpop.f32.mrf.mxu1 }
 0x1dc   :  { %v575_v57 = vadd.f32 %v1167_v31, %v431_v43  ;;  %v614_v7 = vmax.f32 %v560_v1, 0.0  ;;  %v988_v31 = vld [vmem:[%s1693_s3 + $0xd0] sm:$0xff] }
 0x1dd   :  { %v569_v33 = vpop.f32.mrf.mxu1 }
 0x1de   :  { %v570_v59 = vadd.f32 %v569_v33, %v426_v48  ;;  %v617_v63 = vmax.f32 %v575_v57, 0.0  ;;  %v990_v33 = vld [vmem:[%s1693_s3 + $0xe0] sm:$0xff] }
 0x1df   :  { %v1170_v35 = vpop.f32.mrf.mxu1 }
 0x1e0   :  { %v585_v51 = vadd.f32 %v1170_v35, %v441_v37  ;;  %v616_v2 = vmax.f32 %v570_v59, 0.0  ;;  %v661_v35 = vpop.permute.xlu0 %660 }
 0x1e1   :  { %v579_v36 = vpop.f32.mrf.mxu1 }
 0x1e2   :  { %v580_v54 = vadd.f32 %v579_v36, %v436_v39  ;;  %v619_v58 = vmax.f32 %v585_v51, 0.0  ;;  %v666_v36 = vpop.permute.xlu1 %665 }
 0x1e3   :  { %v1173_v38 = vpop.f32.mrf.mxu1 }
 0x1e4   :  { %v595_v45 = vadd.f32 %v1173_v38, %v451_v32  ;;  %v618_v60 = vmax.f32 %v580_v54, 0.0  ;;  %v989_v32 = vld [vmem:[%s1693_s3 + $0xd8] sm:$0xff]  ;;  %v671_v37 = vpop.permute.xlu0 %670 }
 0x1e5   :  { %v589_v40 = vpop.f32.mrf.mxu1 }
 0x1e6   :  { %v590_v49 = vadd.f32 %v589_v40, %v446_v34  ;;  %v621_v52 = vmax.f32 %v595_v45, 0.0  ;;  %v991_v34 = vld [vmem:[%s1693_s3 + $0xe8] sm:$0xff]  ;;  %v676_v38 = vpop.permute.xlu1 %675 }
 0x1e7   :  { %v1176_v41 = vpop.f32.mrf.mxu1 }
 0x1e8   :  { %v605_v42 = vadd.f32 %v1176_v41, %v461_v27  ;;  %v620_v55 = vmax.f32 %v590_v49, 0.0  ;;  %v984_v27 = vld [vmem:[%s1693_s3 + $0xb0] sm:$0xff]  ;;  %v681_v39 = vpop.permute.xlu0 %680 }
 0x1e9   :  { %v599_v44 = vpop.f32.mrf.mxu1 }
 0x1ea   :  { %v623_v46 = vmax.f32 %v605_v42, 0.0  ;;  %v600_v47 = vadd.f32 %v599_v44, %v456_v29  ;;  %v986_v29 = vld [vmem:[%s1693_s3 + $0xc0] sm:$0xff]  ;;  %v686_v40 = vpop.permute.xlu1 %685  ;;  %s1296_s3 = smov [#allocation2]  }
 0x1eb   :  { %s952_s19 = sshll.u32 %s1296_s3, 4  ;;  %s953_s19 = int_to_ptr.vmem [resolvable:$true] %s952_s19 }
 0x1ec   :  { %v622_v50 = vmax.f32 %v600_v47, 0.0  ;;  %1177 = vmatprep.subr.mxu0 %v623_v46  ;;  %1233 = vmatprep.subr.mxu1 %v623_v46  ;;  %v691_v42 = vpop.permute.xlu0 %690  ;;  %s1273_s20 = scalar_lea.vmem %s953_s19, 16  ;;  %s1277_s21 = scalar_lea.vmem %s953_s19, 32 }
 0x1ed   :  { %1178 = vmatpush3.msra.mxu0 %v623_v46  ;;  %1249 = vmatpush3.msra.mxu1 %v623_v46  ;;  %p1274_p0 = scmp.ne.s32.totalorder %s953_s19, %s1273_s20  ;;  %p1278_p1 = scmp.lt.s32.totalorder %s953_s19, %s953_s19 }
 0x1ee   :  { %1179 = vmatprep.subr.mxu0 %v622_v50  ;;  %1234 = vmatprep.subr.mxu1 %v622_v50  ;;  %v696_v46 = vpop.permute.xlu1 %695  ;;  %p1279_p2 = scmp.lt.s32.totalorder %s1277_s21, %s1273_s20 }
 0x1ef   :  { %1180 = vmatpush3.msra.mxu0 %v622_v50  ;;  %1250 = vmatpush3.msra.mxu1 %v622_v50 }
 0x1f0   :  { %1181 = vmatprep.subr.mxu0 %v621_v52  ;;  %1235 = vmatprep.subr.mxu1 %v621_v52  ;;  %p1280_p3 = por %p1279_p2, %p1278_p1 }
 0x1f1   :  { %1182 = vmatpush3.msra.mxu0 %v621_v52  ;;  %1251 = vmatpush3.msra.mxu1 %v621_v52  ;;  %v701_v52 = vpop.permute.xlu0 %700 }
 0x1f2   :  { %1183 = vmatprep.subr.mxu0 %v620_v55  ;;  %1236 = vmatprep.subr.mxu1 %v620_v55  ;;  %p1281_p4 = pnand %p1280_p3, %p1274_p0 }
 0x1f3   :  { %1184 = vmatpush3.msra.mxu0 %v620_v55  ;;  %1252 = vmatpush3.msra.mxu1 %v620_v55 }
 0x1f4   :  { %1185 = vmatprep.subr.mxu0 %v619_v58  ;;  %1237 = vmatprep.subr.mxu1 %v619_v58 }
 0x1f5   :  { %1186 = vmatpush3.msra.mxu0 %v619_v58  ;;  %1253 = vmatpush3.msra.mxu1 %v619_v58  ;;  %v711_v3 = vpop.permute.xlu0 %710 }
 0x1f6   :  { %1187 = vmatprep.subr.mxu0 %v618_v60  ;;  %1238 = vmatprep.subr.mxu1 %v618_v60 }
 0x1f7   :  { %1188 = vmatpush3.msra.mxu0 %v618_v60  ;;  %1254 = vmatpush3.msra.mxu1 %v618_v60  ;;  %v706_v60 = vpop.permute.xlu1 %705 }
 0x1f8   :  { %1189 = vmatprep.subr.mxu0 %v617_v63  ;;  %1239 = vmatprep.subr.mxu1 %v617_v63 }
 0x1f9   :  { %1190 = vmatpush3.msra.mxu0 %v617_v63  ;;  %1255 = vmatpush3.msra.mxu1 %v617_v63 }
 0x1fa   :  { %1191 = vmatprep.subr.mxu0 %v616_v2  ;;  %1240 = vmatprep.subr.mxu1 %v616_v2 }
 0x1fb   :  { %1192 = vmatpush3.msra.mxu0 %v616_v2  ;;  %1256 = vmatpush3.msra.mxu1 %v616_v2 }
 0x1fc   :  { %1193 = vmatprep.subr.mxu0 %v615_v6  ;;  %1241 = vmatprep.subr.mxu1 %v615_v6 }
 0x1fd   :  { %1194 = vmatpush3.msra.mxu0 %v615_v6  ;;  %1257 = vmatpush3.msra.mxu1 %v615_v6 }
 0x1fe   :  { %1195 = vmatprep.subr.mxu0 %v614_v7  ;;  %1242 = vmatprep.subr.mxu1 %v614_v7 }
 0x1ff   :  { %1196 = vmatpush3.msra.mxu0 %v614_v7  ;;  %1258 = vmatpush3.msra.mxu1 %v614_v7 }
 0x200   :  { %1197 = vmatprep.subr.mxu0 %v613_v10  ;;  %1243 = vmatprep.subr.mxu1 %v613_v10 }
 0x201   :  { %1198 = vmatpush3.msra.mxu0 %v613_v10  ;;  %1259 = vmatpush3.msra.mxu1 %v613_v10 }
 0x202   :  { %1199 = vmatprep.subr.mxu0 %v612_v12  ;;  %1244 = vmatprep.subr.mxu1 %v612_v12 }
 0x203   :  { %1200 = vmatpush3.msra.mxu0 %v612_v12  ;;  %1260 = vmatpush3.msra.mxu1 %v612_v12  ;;  %v716_v12 = vpop.permute.xlu1 %715 }
 0x204   :  { %1201 = vmatprep.subr.mxu0 %v611_v15  ;;  %1245 = vmatprep.subr.mxu1 %v611_v15 }
 0x205   :  { %1202 = vmatpush3.msra.mxu0 %v611_v15  ;;  %1261 = vmatpush3.msra.mxu1 %v611_v15 }
 0x206   :  { %1203 = vmatprep.subr.mxu0 %v610_v18  ;;  %1246 = vmatprep.subr.mxu1 %v610_v18 }
 0x207   :  { %1204 = vmatpush3.msra.mxu0 %v610_v18  ;;  %1262 = vmatpush3.msra.mxu1 %v610_v18 }
 0x208   :  { %1205 = vmatprep.subr.mxu0 %v609_v19  ;;  %1247 = vmatprep.subr.mxu1 %v609_v19 }
 0x209   :  { %1206 = vmatpush3.msra.mxu0 %v609_v19  ;;  %1263 = vmatpush3.msra.mxu1 %v609_v19 }
 0x20a   :  { %1207 = vmatprep.subr.mxu0 %v608_v20  ;;  %1248 = vmatprep.subr.mxu1 %v608_v20 }
 0x20b   :  { %1208 = vmatpush3.msra.mxu0 %v608_v20  ;;  %1264 = vmatpush3.msra.mxu1 %v608_v20 }
 0x20c   :  { %1210 = vmatmul.mubr.f32.vlgmr.msra.gmra.mxu0 %v979_v21  ;;  %1231 = vmatmul.mubr.f32.vlgmr.msra.gmra.mxu1 %v993_v22  ;;  %v721_v21 = vpop.permute.xlu0 %720 }
 0x20d   :  { %1212 = vmatprep.mubr.f32.mxu0 %v980_v23 }
 0x210   :  { %1213 = vmatmul.mubr.f32.gmra.mxu0 %v981_v24 }
 0x211   :  { %1215 = vmatprep.mubr.f32.mxu0 %v982_v25 }
 0x214   :  { %1216 = vmatmul.mubr.f32.gmra.mxu0 %v983_v26 }
 0x215   :  { %1218 = vmatprep.mubr.f32.mxu0 %v984_v27 }
 0x218   :  { %1219 = vmatmul.mubr.f32.gmra.mxu0 %v985_v28 }
 0x219   :  { %1221 = vmatprep.mubr.f32.mxu0 %v986_v29 }
 0x21c   :  { %1222 = vmatmul.mubr.f32.gmra.mxu0 %v987_v30 }
 0x21d   :  { %1224 = vmatprep.mubr.f32.mxu0 %v988_v31  ;;  %v726_v31 = vpop.permute.xlu1 %725 }
 0x220   :  { %1225 = vmatmul.mubr.f32.gmra.mxu0 %v989_v32 }
 0x221   :  { %1227 = vmatprep.mubr.f32.mxu0 %v990_v33 }
 0x224   :  { %1228 = vmatmul.mubr.f32.gmra.mxu0 %v991_v34 }
 0x2cc   :  { %v1211_v41 = vpop.f32.mrf.mxu0  ;;  %v1232_v24 = vpop.f32.mrf.mxu1 }
 0x2cd   :  { %v810_v43 = vadd.f32 %v1211_v41, %v666_v36 }
 0x2ce   :  { %v804_v44 = vpop.f32.mrf.mxu0  ;;  %v874_v36 = vpop.f32.mrf.mxu1 }
 0x2cf   :  { %v805_v45 = vadd.f32 %v804_v44, %v661_v35  ;;  %v884_v48 = vmax.f32 %v810_v43, 0.0  ;;  %v731_v43 = vpop.permute.xlu0 %730 }
 0x2d0   :  { %v1214_v47 = vpop.f32.mrf.mxu0 }
 0x2d1   :  { %v883_v49 = vmax.f32 %v805_v45, 0.0  ;;  %v820_v50 = vadd.f32 %v1214_v47, %v676_v38  ;;  %v900_v56 = vsel %vm135_vm0, %v884_v48, 0.0 }
 0x2d2   :  { %v814_v51 = vpop.f32.mrf.mxu0 }
 0x2d3   :  { %v899_v53 = vsel %vm135_vm0, %v883_v49, 0.0  ;;  %v815_v54 = vadd.f32 %v814_v51, %v671_v37  ;;  %v886_v57 = vmax.f32 %v820_v50, 0.0  ;;  %v736_v49 = vpop.permute.xlu1 %735 }
 0x2d4   :  { %v1217_v55 = vpop.f32.mrf.mxu0  ;;  %v901_v61 = vadd.f32 %v900_v56, %v899_v53  ;;  %v880_v51 = vadd.f32 %v1232_v24, %v736_v49 }
 0x2d5   :  { %v885_v58 = vmax.f32 %v815_v54, 0.0  ;;  %v830_v59 = vadd.f32 %v1217_v55, %v686_v40  ;;  %v904_v6 = vsel %vm135_vm0, %v886_v57, 0.0 }
 0x2d6   :  { %v824_v62 = vpop.f32.mrf.mxu0 }
 0x2d7   :  { %v902_v63 = vsel %vm135_vm0, %v885_v58, 0.0  ;;  %v825_v0 = vadd.f32 %v824_v62, %v681_v39  ;;  %v888_v4 = vmax.f32 %v830_v59, 0.0  ;;  %v898_v59 = vmax.f32 %v880_v51, 0.0 }
 0x2d8   :  { %v903_v1 = vadd.f32 %v902_v63, %v901_v61  ;;  %v1220_v2 = vpop.f32.mrf.mxu0 }
 0x2d9   :  { %v887_v5 = vmax.f32 %v825_v0, 0.0  ;;  %v840_v7 = vadd.f32 %v1220_v2, %v696_v46  ;;  %v908_v15 = vsel %vm135_vm0, %v888_v4, 0.0  ;;  %v875_v46 = vadd.f32 %v874_v36, %v731_v43 }
 0x2da   :  { %v905_v8 = vadd.f32 %v904_v6, %v903_v1  ;;  %v834_v9 = vpop.f32.mrf.mxu0  ;;  %v928_v0 = vsel %vm135_vm0, %v898_v59, 0.0 }
 0x2db   :  { %v906_v10 = vsel %vm135_vm0, %v887_v5, 0.0  ;;  %v835_v11 = vadd.f32 %v834_v9, %v691_v42  ;;  %v890_v16 = vmax.f32 %v840_v7, 0.0  ;;  %v897_v56 = vmax.f32 %v875_v46, 0.0 }
 0x2dc   :  { %v907_v13 = vadd.f32 %v906_v10, %v905_v8  ;;  %v1223_v14 = vpop.f32.mrf.mxu0 }
 0x2dd   :  { %v889_v17 = vmax.f32 %v835_v11, 0.0  ;;  %v850_v18 = vadd.f32 %v1223_v14, %v706_v60  ;;  %v912_v27 = vsel %vm135_vm0, %v890_v16, 0.0  ;;  %v926_v62 = vsel %vm135_vm0, %v897_v56, 0.0 }
 0x2de   :  { %v909_v19 = vadd.f32 %v908_v15, %v907_v13  ;;  %v844_v20 = vpop.f32.mrf.mxu0 }
 0x2df   :  { %v910_v22 = vsel %vm135_vm0, %v889_v17, 0.0  ;;  %v845_v23 = vadd.f32 %v844_v20, %v701_v52  ;;  %v892_v28 = vmax.f32 %v850_v18, 0.0 }
 0x2e0   :  { %v911_v25 = vadd.f32 %v910_v22, %v909_v19  ;;  %v1226_v26 = vpop.f32.mrf.mxu0 }
 0x2e1   :  { %v891_v29 = vmax.f32 %v845_v23, 0.0  ;;  %v860_v30 = vadd.f32 %v1226_v26, %v716_v12  ;;  %v916_v39 = vsel %vm135_vm0, %v892_v28, 0.0 }
 0x2e2   :  { %v913_v32 = vadd.f32 %v912_v27, %v911_v25  ;;  %v854_v33 = vpop.f32.mrf.mxu0 }
 0x2e3   :  { %v914_v34 = vsel %vm135_vm0, %v891_v29, 0.0  ;;  %v855_v35 = vadd.f32 %v854_v33, %v711_v3  ;;  %v894_v40 = vmax.f32 %v860_v30, 0.0 }
 0x2e4   :  { %v915_v37 = vadd.f32 %v914_v34, %v913_v32  ;;  %v1229_v38 = vpop.f32.mrf.mxu0 }
 0x2e5   :  { %v893_v41 = vmax.f32 %v855_v35, 0.0  ;;  %v870_v42 = vadd.f32 %v1229_v38, %v726_v31  ;;  %v920_v52 = vsel %vm135_vm0, %v894_v40, 0.0 }
 0x2e6   :  { %v917_v44 = vadd.f32 %v916_v39, %v915_v37  ;;  %v864_v45 = vpop.f32.mrf.mxu0 }
 0x2e7   :  { %v918_v47 = vsel %vm135_vm0, %v893_v41, 0.0  ;;  %v865_v48 = vadd.f32 %v864_v45, %v721_v21  ;;  %v896_v53 = vmax.f32 %v870_v42, 0.0 }
 0x2e8   :  { %v919_v50 = vadd.f32 %v918_v47, %v917_v44 }
 0x2e9   :  { %v895_v54 = vmax.f32 %v865_v48, 0.0  ;;  %v924_v60 = vsel %vm135_vm0, %v896_v53, 0.0 }
 0x2ea   :  { %v921_v55 = vadd.f32 %v920_v52, %v919_v50 }
 0x2eb   :  { %v922_v57 = vsel %vm135_vm0, %v895_v54, 0.0 }
 0x2ec   :  { %v923_v58 = vadd.f32 %v922_v57, %v921_v55 }
 0x2ee   :  { %v925_v61 = vadd.f32 %v924_v60, %v923_v58 }
 0x2f0   :  { %v927_v63 = vadd.f32 %v926_v62, %v925_v61 }
 0x2f2   :  { %v929_v1 = vadd.f32 %v928_v0, %v927_v63 }
 0x2f4   :  { %v930_v2 = vrot.slane %v929_v1, 4 }
 0x2f6   :  { %v931_v3 = vadd.f32 %v930_v2, %v929_v1 }
 0x2f8   :  { %v932_v6 = vrot.slane %v931_v3, 2 }
 0x2fa   :  { %v933_v4 = vadd.f32 %v932_v6, %v931_v3 }
 0x2fc   :  { %v934_v5 = vrot.slane %v933_v4, 1 }
 0x2fe   :  { %v935_v7 = vadd.f32 %v934_v5, %v933_v4 }
 0x300   :  { %v936_v8 = vmul.f32 0.5, %v935_v7 }
 0x302   :  { %v937_v9 = vadd.f32 0.5, %v936_v8 }
 0x304   :  { %v1010_v10 = vmul.f32 -1.442695, %v937_v9 }
 0x306   :  { %1269 = vpow2.f32 %v1010_v10 }
 0x313   :  { %v1270_v11 = vpop.eup %1269 }
 0x314   :  { %v941_v12 = vadd.f32 1.0, %v1270_v11 }
 0x316   :  { %1271 = vrcp.f32 %v941_v12 }
 0x323   :  { %v1272_v13 = vpop.eup %1271 }
 0x324   :  { %945 = vst.msk [vmem:[#allocation2] sm:$0x1] %vm944_vm1, %v1272_v13 }
 0x325   :  { %1284 = shalt.err (!%p1281_p4)
}
 0x326   :  { %955 = dma.vmem_to_hbm [thread:$0]  %s953_s19, 16, %s1695_s5, [#allocation3]  }
 0x327   :  { %1293 = dma.done.wait [#allocation3], 16  }
 0x328   :  { %1294 = vsyncadd [#allocation3], 4294967280 }
 0x329   :  { %959 = vsyncpa [#allocation3], 1 }

</bundles_post_ra>
